<compile_context>
chip_gen: v7x
topology: tpu7x:2x2x1
jax: 0.10.0
libtpu: 0.0.40
codegen_flags: <defaults>
</compile_context>

<pallas_src>
import numpy as np
import jax
import jax.numpy as jnp
from jax import lax
from jax.experimental import pallas as pl
from jax.experimental.pallas import tpu as pltpu


# ------------------------- fused Pallas kernel -------------------------

def cnn_lstm_fused_kernel(xim_ref, wconv_ref, shift_ref, wih_ref, whh_ref, b_ref,
                          wfc_ref, bfc_ref, o_ref, xp_ref):
    # xim_ref:   (T, Bp, 3*Cin) f32   time-major im2col input (batch padded to 8)
    # wconv_ref: (3*Cin, Cc)    bf16  conv taps with BN scale folded in
    # shift_ref: (1, Cc)        f32   folded BN shift (includes conv bias)
    # wih_ref:   (Cc, 4H) bf16, whh_ref: (H, 4H) bf16, b_ref: (1, 4H) f32
    # wfc_ref:   (H, Op) f32, bfc_ref: (1, Op) f32
    # o_ref:     (Bp, Op) f32
    # xp_ref:    (S, Bp, 4H) f32 VMEM scratch (hoisted LSTM input projection)
    T, Bp, Cin3 = xim_ref.shape
    Cc = shift_ref.shape[1]
    H = whh_ref.shape[0]
    S = xp_ref.shape[0]                      # = T // 2 (MaxPool1d floor behavior)
    H4 = 4 * H

    # ---- Conv1d(k=3, pad=1) as ONE im2col matmul (BN scale already folded) ----
    xim = xim_ref[...].reshape(T * Bp, Cin3).astype(jnp.bfloat16)
    y = jnp.dot(xim, wconv_ref[...], preferred_element_type=jnp.float32)
    y = jnp.maximum(y + shift_ref[...], 0.0)            # BN shift (+bias) + ReLU

    # ---- MaxPool1d(kernel=2, stride=2): tile-aligned pairwise max ----
    y4 = y[:2 * S * Bp].reshape(S, 2, Bp, Cc)            # minor dims stay (Bp, Cc)
    seq = jnp.maximum(y4[:, 0], y4[:, 1]).reshape(S * Bp, Cc)

    # ---- LSTM: input projection hoisted out of the recurrence, kept in VMEM ----
    xp_ref[...] = (jnp.dot(seq.astype(jnp.bfloat16), wih_ref[...],
                           preferred_element_type=jnp.float32)
                   + b_ref[...]).reshape(S, Bp, H4)

    whh = whh_ref[...]                                   # (H, 4H) bf16

    def step(t, carry):
        h, c = carry
        gates = xp_ref[t] + jnp.dot(h.astype(jnp.bfloat16), whh,
                                    preferred_element_type=jnp.float32)
        i_g = jax.nn.sigmoid(gates[:, 0 * H:1 * H])
        f_g = jax.nn.sigmoid(gates[:, 1 * H:2 * H])
        g_g = jnp.tanh(gates[:, 2 * H:3 * H])
        o_g = jax.nn.sigmoid(gates[:, 3 * H:4 * H])
        c = f_g * c + i_g * g_g
        h = o_g * jnp.tanh(c)
        return h, c

    h0 = jnp.zeros((Bp, H), jnp.float32)
    c0 = jnp.zeros((Bp, H), jnp.float32)
    h, _ = lax.fori_loop(0, S, step, (h0, c0), unroll=True)

    # Dropout(rate=0) is identity; final Linear on the last hidden state
    # (output dim padded to a full 128-lane tile -> unmasked store).
    o_ref[...] = (jnp.dot(h, wfc_ref[...], preferred_element_type=jnp.float32)
                  + bfc_ref[...])


# ------------------------- wrapper -------------------------

def _full_spec(shape):
    nd = len(shape)
    return pl.BlockSpec(shape, lambda i, nd=nd: (0,) * nd)


def cnn_lstm_forward(x, params):
    """x: (B, T, C_in) float32 -> (B, output_size) float32."""
    B, T, Cin = x.shape
    Cc = params["conv_w"].shape[0]          # 64
    H = params["w_hh"].shape[1]             # hidden_size
    O = params["fc_w"].shape[0]             # output_size
    eps = 1e-5

    Bp = ((B + 7) // 8) * 8                 # pad batch to f32 sublane multiple
    Op = ((O + 127) // 128) * 128           # pad FC output to full lane tile
    S = T // 2                              # MaxPool1d floor behavior

    # Fold BatchNorm (eval mode, running stats): scale into the conv weights,
    # shift (incl. conv bias) stays as a single per-channel add.
    # TODO(synk): train-mode BatchNorm (per-batch statistics) not implemented;
    # eval-mode running stats are used instead.
    scale = params["bn_gamma"] / jnp.sqrt(params["bn_var"] + eps)            # (Cc,)
    shift = params["bn_beta"] + (params["conv_b"] - params["bn_mean"]) * scale
    w_conv = (jnp.transpose(params["conv_w"], (2, 1, 0))                     # (3, Cin, Cc)
              * scale[None, None, :]).reshape(3 * Cin, Cc).astype(jnp.bfloat16)

    # Wrapper layout ops (fused by XLA into one copy of the tiny input):
    # pad batch to Bp, transpose to time-major, zero-pad time, im2col the 3 taps.
    x_tm = jnp.transpose(x, (1, 0, 2))                                       # (T, B, Cin)
    x_tm = jnp.pad(x_tm, ((1, 1), (0, Bp - B), (0, 0)))                      # (T+2, Bp, Cin)
    x_im2col = jnp.concatenate(
        [x_tm[0:T], x_tm[1:T + 1], x_tm[2:T + 2]], axis=-1)                  # (T, Bp, 3*Cin)

    wih_t = jnp.transpose(params["w_ih"]).astype(jnp.bfloat16)               # (Cc, 4H)
    whh_t = jnp.transpose(params["w_hh"]).astype(jnp.bfloat16)               # (H, 4H)
    b_sum = (params["b_ih"] + params["b_hh"]).reshape(1, 4 * H)
    wfc_t = jnp.zeros((H, Op), jnp.float32).at[:, :O].set(
        jnp.transpose(params["fc_w"]))                                       # (H, Op)
    bfc = jnp.zeros((1, Op), jnp.float32).at[:, :O].set(params["fc_b"])

    # TODO(synk): for large real-model shapes, add a "parallel" batch grid axis
    # (v7x has 2 TensorCores) and tile time/batch against v7x's 64 MiB VMEM.
    out = pl.pallas_call(
        cnn_lstm_fused_kernel,
        out_shape=jax.ShapeDtypeStruct((Bp, Op), jnp.float32),
        grid=(1,),
        in_specs=[_full_spec((T, Bp, 3 * Cin)),
                  _full_spec((3 * Cin, Cc)),
                  _full_spec((1, Cc)),
                  _full_spec((Cc, 4 * H)),
                  _full_spec((H, 4 * H)),
                  _full_spec((1, 4 * H)),
                  _full_spec((H, Op)),
                  _full_spec((1, Op))],
        out_specs=_full_spec((Bp, Op)),
        scratch_shapes=[pltpu.VMEM((S, Bp, 4 * H), jnp.float32)],
        compiler_params=pltpu.CompilerParams(
            dimension_semantics=("arbitrary",)),
    )(x_im2col, w_conv, shift.reshape(1, Cc), wih_t, whh_t, b_sum, wfc_t, bfc)

    return out[:B, :O]


# ------------------------- pure-JAX reference -------------------------

def reference_forward(x, params):
    eps = 1e-5
    H = params["w_hh"].shape[1]
    xp = jnp.transpose(x, (0, 2, 1))                                         # (B, Cin, T)
    y = lax.conv_general_dilated(xp, params["conv_w"], (1,), ((1, 1),),
                                 dimension_numbers=("NCH", "OIH", "NCH"))
    y = y + params["conv_b"][None, :, None]
    y = ((y - params["bn_mean"][None, :, None])
         / jnp.sqrt(params["bn_var"][None, :, None] + eps)
         * params["bn_gamma"][None, :, None] + params["bn_beta"][None, :, None])
    y = jnp.maximum(y, 0.0)
    Bb, Cc, Tt = y.shape
    y = jnp.max(y.reshape(Bb, Cc, Tt // 2, 2), axis=3)                       # maxpool
    seq = jnp.transpose(y, (0, 2, 1))                                        # (B, S, Cc)

    h = jnp.zeros((Bb, H), jnp.float32)
    c = jnp.zeros((Bb, H), jnp.float32)
    for t in range(seq.shape[1]):
        gates = (seq[:, t] @ params["w_ih"].T + params["b_ih"]
                 + h @ params["w_hh"].T + params["b_hh"])
        i_g = jax.nn.sigmoid(gates[:, :H])
        f_g = jax.nn.sigmoid(gates[:, H:2 * H])
        g_g = jnp.tanh(gates[:, 2 * H:3 * H])
        o_g = jax.nn.sigmoid(gates[:, 3 * H:])
        c = f_g * c + i_g * g_g
        h = o_g * jnp.tanh(c)
    return h @ params["fc_w"].T + params["fc_b"]


# ------------------------- main -------------------------

if __name__ == "__main__":
    B, T, Cin = 2, 16, 16          # small input_size instead of 229
    Cc = 64                        # fixed by the module
    H = 128                        # hidden_size (module default)
    O = 5                          # output_size

    key = jax.random.PRNGKey(0)
    ks = jax.random.split(key, 9)
    params = {
        "conv_w": 0.1 * jax.random.normal(ks[0], (Cc, Cin, 3), jnp.float32),
        "conv_b": 0.1 * jax.random.normal(ks[1], (Cc,), jnp.float32),
        "bn_gamma": jnp.ones((Cc,), jnp.float32),
        "bn_beta": jnp.zeros((Cc,), jnp.float32),
        "bn_mean": jnp.zeros((Cc,), jnp.float32),
        "bn_var": jnp.ones((Cc,), jnp.float32),
        "w_ih": 0.1 * jax.random.normal(ks[2], (4 * H, Cc), jnp.float32),
        "w_hh": 0.1 * jax.random.normal(ks[3], (4 * H, H), jnp.float32),
        "b_ih": 0.1 * jax.random.normal(ks[4], (4 * H,), jnp.float32),
        "b_hh": 0.1 * jax.random.normal(ks[5], (4 * H,), jnp.float32),
        "fc_w": 0.1 * jax.random.normal(ks[6], (O, H), jnp.float32),
        "fc_b": 0.1 * jax.random.normal(ks[7], (O,), jnp.float32),
    }

    x = jax.random.normal(ks[8], (B, T, Cin), jnp.float32)

    out = cnn_lstm_forward(x, params)
    out = jax.block_until_ready(out)

    ref = jax.block_until_ready(reference_forward(x, params))
    assert out.shape == (B, O), out.shape
    assert np.allclose(np.asarray(out), np.asarray(ref), atol=2e-2, rtol=2e-2), (
        "mismatch vs reference")

    print("KERNEL_OK")
</pallas_src>

<mosaic_0001>
module attributes {stable_mosaic.version = 11 : i64} {
  func.func @cnn_lstm_fused_kernel(%arg0: i32, %arg1: memref<16x8x48xf32, #tpu.memory_space<vmem>>, %arg2: memref<48x64xbf16, #tpu.memory_space<vmem>>, %arg3: memref<1x64xf32, #tpu.memory_space<vmem>>, %arg4: memref<64x512xbf16, #tpu.memory_space<vmem>>, %arg5: memref<128x512xbf16, #tpu.memory_space<vmem>>, %arg6: memref<1x512xf32, #tpu.memory_space<vmem>>, %arg7: memref<128x128xf32, #tpu.memory_space<vmem>>, %arg8: memref<1x128xf32, #tpu.memory_space<vmem>>, %arg9: memref<8x128xf32, #tpu.memory_space<vmem>>, %arg10: memref<8x8x512xf32, #tpu.memory_space<vmem>>) attributes {dimension_semantics = [#tpu.dimension_semantics<arbitrary>], iteration_bounds = array<i64: 1>, scalar_prefetch = 0 : i64, scratch_operands = 1 : i64, tpu.core_type = #tpu.core_type<tc>, window_params = [{pipeline_mode = #tpu.pipeline_mode<synchronous>, transform_indices = @transform_0, window_bounds = array<i64: 16, 8, 48>}, {pipeline_mode = #tpu.pipeline_mode<synchronous>, transform_indices = @transform_1, window_bounds = array<i64: 48, 64>}, {pipeline_mode = #tpu.pipeline_mode<synchronous>, transform_indices = @transform_2, window_bounds = array<i64: 1, 64>}, {pipeline_mode = #tpu.pipeline_mode<synchronous>, transform_indices = @transform_3, window_bounds = array<i64: 64, 512>}, {pipeline_mode = #tpu.pipeline_mode<synchronous>, transform_indices = @transform_4, window_bounds = array<i64: 128, 512>}, {pipeline_mode = #tpu.pipeline_mode<synchronous>, transform_indices = @transform_5, window_bounds = array<i64: 1, 512>}, {pipeline_mode = #tpu.pipeline_mode<synchronous>, transform_indices = @transform_6, window_bounds = array<i64: 128, 128>}, {pipeline_mode = #tpu.pipeline_mode<synchronous>, transform_indices = @transform_7, window_bounds = array<i64: 1, 128>}, {pipeline_mode = #tpu.pipeline_mode<synchronous>, transform_indices = @transform_8, window_bounds = array<i64: 8, 128>}]} {
    %c0 = arith.constant 0 : index
    %c0_0 = arith.constant 0 : index
    %c0_1 = arith.constant 0 : index
    %0 = vector.load %arg1[%c0, %c0_0, %c0_1] : memref<16x8x48xf32, #tpu.memory_space<vmem>>, vector<16x8x48xf32>
    %1 = vector.shape_cast %0 : vector<16x8x48xf32> to vector<128x48xf32>
    %2 = arith.truncf %1 : vector<128x48xf32> to vector<128x48xbf16>
    %c0_2 = arith.constant 0 : index
    %c0_3 = arith.constant 0 : index
    %3 = vector.load %arg2[%c0_2, %c0_3] : memref<48x64xbf16, #tpu.memory_space<vmem>>, vector<48x64xbf16>
    %cst = arith.constant dense<0.000000e+00> : vector<128x64xf32>
    %4 = tpu.matmul %2, %3, %cst {dimension_numbers = #tpu.dot_dimension_numbers<[1], [0], [0], [1], [0, 0, 1, 1], [], []>} : vector<128x48xbf16>, vector<48x64xbf16>, vector<128x64xf32> -> vector<128x64xf32>
    %c0_4 = arith.constant 0 : index
    %c0_5 = arith.constant 0 : index
    %5 = vector.load %arg3[%c0_4, %c0_5] : memref<1x64xf32, #tpu.memory_space<vmem>>, vector<1x64xf32>
    %6 = vector.broadcast %5 : vector<1x64xf32> to vector<128x64xf32>
    %7 = arith.addf %4, %6 : vector<128x64xf32>
    %cst_6 = arith.constant 0.000000e+00 : f32
    %8 = vector.broadcast %cst_6 : f32 to vector<128x64xf32>
    %9 = arith.maximumf %7, %8 : vector<128x64xf32>
    %10 = vector.shape_cast %9 : vector<128x64xf32> to vector<8x2x8x64xf32>
    %11 = vector.extract_strided_slice %10 {offsets = [0, 0, 0, 0], sizes = [8, 1, 8, 64], strides = [1, 1, 1, 1]} : vector<8x2x8x64xf32> to vector<8x1x8x64xf32>
    %12 = vector.shape_cast %11 : vector<8x1x8x64xf32> to vector<8x8x64xf32>
    %13 = vector.extract_strided_slice %10 {offsets = [0, 1, 0, 0], sizes = [8, 1, 8, 64], strides = [1, 1, 1, 1]} : vector<8x2x8x64xf32> to vector<8x1x8x64xf32>
    %14 = vector.shape_cast %13 : vector<8x1x8x64xf32> to vector<8x8x64xf32>
    %15 = arith.maximumf %12, %14 : vector<8x8x64xf32>
    %16 = vector.shape_cast %15 : vector<8x8x64xf32> to vector<64x64xf32>
    %17 = arith.truncf %16 : vector<64x64xf32> to vector<64x64xbf16>
    %c0_7 = arith.constant 0 : index
    %c0_8 = arith.constant 0 : index
    %18 = vector.load %arg4[%c0_7, %c0_8] : memref<64x512xbf16, #tpu.memory_space<vmem>>, vector<64x512xbf16>
    %cst_9 = arith.constant dense<0.000000e+00> : vector<64x512xf32>
    %19 = tpu.matmul %17, %18, %cst_9 {dimension_numbers = #tpu.dot_dimension_numbers<[1], [0], [0], [1], [0, 0, 1, 1], [], []>} : vector<64x64xbf16>, vector<64x512xbf16>, vector<64x512xf32> -> vector<64x512xf32>
    %c0_10 = arith.constant 0 : index
    %c0_11 = arith.constant 0 : index
    %20 = vector.load %arg6[%c0_10, %c0_11] : memref<1x512xf32, #tpu.memory_space<vmem>>, vector<1x512xf32>
    %21 = vector.broadcast %20 : vector<1x512xf32> to vector<64x512xf32>
    %22 = arith.addf %19, %21 : vector<64x512xf32>
    %23 = vector.shape_cast %22 : vector<64x512xf32> to vector<8x8x512xf32>
    %c0_12 = arith.constant 0 : index
    %c0_13 = arith.constant 0 : index
    %c0_14 = arith.constant 0 : index
    %24 = vector.load %arg10[%c0_12, %c0_13, %c0_14] : memref<8x8x512xf32, #tpu.memory_space<vmem>>, vector<8x8x512xf32>
    tpu.vector_store %arg10[%c0_12, %c0_13, %c0_14], %23 {strides = array<i32>} : memref<8x8x512xf32, #tpu.memory_space<vmem>>, vector<8x8x512xf32>,
    %c0_15 = arith.constant 0 : index
    %c0_16 = arith.constant 0 : index
    %25 = vector.load %arg5[%c0_15, %c0_16] : memref<128x512xbf16, #tpu.memory_space<vmem>>, vector<128x512xbf16>
    %cst_17 = arith.constant 0.000000e+00 : f32
    %26 = vector.broadcast %cst_17 : f32 to vector<8x128xf32>
    %cst_18 = arith.constant 0.000000e+00 : f32
    %27 = vector.broadcast %cst_18 : f32 to vector<8x128xf32>
    %c0_i32 = arith.constant 0 : i32
    %28 = arith.index_cast %c0_i32 : i32 to index
    %c0_19 = arith.constant 0 : index
    %c0_20 = arith.constant 0 : index
    %29 = vector.load %arg10[%28, %c0_19, %c0_20] : memref<8x8x512xf32, #tpu.memory_space<vmem>>, vector<1x8x512xf32>
    %30 = vector.shape_cast %29 : vector<1x8x512xf32> to vector<8x512xf32>
    %31 = arith.truncf %26 : vector<8x128xf32> to vector<8x128xbf16>
    %cst_21 = arith.constant dense<0.000000e+00> : vector<8x512xf32>
    %32 = tpu.matmul %31, %25, %cst_21 {dimension_numbers = #tpu.dot_dimension_numbers<[1], [0], [0], [1], [0, 0, 1, 1], [], []>} : vector<8x128xbf16>, vector<128x512xbf16>, vector<8x512xf32> -> vector<8x512xf32>
    %33 = arith.addf %30, %32 : vector<8x512xf32>
    %34 = vector.extract_strided_slice %33 {offsets = [0, 0], sizes = [8, 128], strides = [1, 1]} : vector<8x512xf32> to vector<8x128xf32>
    %35 = arith.negf %34 : vector<8x128xf32>
    %36 = math.exp %35 : vector<8x128xf32>
    %cst_22 = arith.constant 1.000000e+00 : f32
    %37 = vector.broadcast %cst_22 : f32 to vector<8x128xf32>
    %38 = arith.addf %37, %36 : vector<8x128xf32>
    %39 = arith.divf %37, %38 : vector<8x128xf32>
    %40 = vector.extract_strided_slice %33 {offsets = [0, 128], sizes = [8, 128], strides = [1, 1]} : vector<8x512xf32> to vector<8x128xf32>
    %41 = arith.negf %40 : vector<8x128xf32>
    %42 = math.exp %41 : vector<8x128xf32>
    %cst_23 = arith.constant 1.000000e+00 : f32
    %43 = vector.broadcast %cst_23 : f32 to vector<8x128xf32>
    %44 = arith.addf %43, %42 : vector<8x128xf32>
    %45 = arith.divf %43, %44 : vector<8x128xf32>
    %46 = vector.extract_strided_slice %33 {offsets = [0, 256], sizes = [8, 128], strides = [1, 1]} : vector<8x512xf32> to vector<8x128xf32>
    %47 = math.tanh %46 : vector<8x128xf32>
    %48 = vector.extract_strided_slice %33 {offsets = [0, 384], sizes = [8, 128], strides = [1, 1]} : vector<8x512xf32> to vector<8x128xf32>
    %49 = arith.negf %48 : vector<8x128xf32>
    %50 = math.exp %49 : vector<8x128xf32>
    %cst_24 = arith.constant 1.000000e+00 : f32
    %51 = vector.broadcast %cst_24 : f32 to vector<8x128xf32>
    %52 = arith.addf %51, %50 : vector<8x128xf32>
    %53 = arith.divf %51, %52 : vector<8x128xf32>
    %54 = arith.mulf %45, %27 : vector<8x128xf32>
    %55 = arith.mulf %39, %47 : vector<8x128xf32>
    %56 = arith.addf %54, %55 : vector<8x128xf32>
    %57 = math.tanh %56 : vector<8x128xf32>
    %58 = arith.mulf %53, %57 : vector<8x128xf32>
    %c1_i32 = arith.constant 1 : i32
    %59 = arith.index_cast %c1_i32 : i32 to index
    %c0_25 = arith.constant 0 : index
    %c0_26 = arith.constant 0 : index
    %60 = vector.load %arg10[%59, %c0_25, %c0_26] : memref<8x8x512xf32, #tpu.memory_space<vmem>>, vector<1x8x512xf32>
    %61 = vector.shape_cast %60 : vector<1x8x512xf32> to vector<8x512xf32>
    %62 = arith.truncf %58 : vector<8x128xf32> to vector<8x128xbf16>
    %cst_27 = arith.constant dense<0.000000e+00> : vector<8x512xf32>
    %63 = tpu.matmul %62, %25, %cst_27 {dimension_numbers = #tpu.dot_dimension_numbers<[1], [0], [0], [1], [0, 0, 1, 1], [], []>} : vector<8x128xbf16>, vector<128x512xbf16>, vector<8x512xf32> -> vector<8x512xf32>
    %64 = arith.addf %61, %63 : vector<8x512xf32>
    %65 = vector.extract_strided_slice %64 {offsets = [0, 0], sizes = [8, 128], strides = [1, 1]} : vector<8x512xf32> to vector<8x128xf32>
    %66 = arith.negf %65 : vector<8x128xf32>
    %67 = math.exp %66 : vector<8x128xf32>
    %cst_28 = arith.constant 1.000000e+00 : f32
    %68 = vector.broadcast %cst_28 : f32 to vector<8x128xf32>
    %69 = arith.addf %68, %67 : vector<8x128xf32>
    %70 = arith.divf %68, %69 : vector<8x128xf32>
    %71 = vector.extract_strided_slice %64 {offsets = [0, 128], sizes = [8, 128], strides = [1, 1]} : vector<8x512xf32> to vector<8x128xf32>
    %72 = arith.negf %71 : vector<8x128xf32>
    %73 = math.exp %72 : vector<8x128xf32>
    %cst_29 = arith.constant 1.000000e+00 : f32
    %74 = vector.broadcast %cst_29 : f32 to vector<8x128xf32>
    %75 = arith.addf %74, %73 : vector<8x128xf32>
    %76 = arith.divf %74, %75 : vector<8x128xf32>
    %77 = vector.extract_strided_slice %64 {offsets = [0, 256], sizes = [8, 128], strides = [1, 1]} : vector<8x512xf32> to vector<8x128xf32>
    %78 = math.tanh %77 : vector<8x128xf32>
    %79 = vector.extract_strided_slice %64 {offsets = [0, 384], sizes = [8, 128], strides = [1, 1]} : vector<8x512xf32> to vector<8x128xf32>
    %80 = arith.negf %79 : vector<8x128xf32>
    %81 = math.exp %80 : vector<8x128xf32>
    %cst_30 = arith.constant 1.000000e+00 : f32
    %82 = vector.broadcast %cst_30 : f32 to vector<8x128xf32>
    %83 = arith.addf %82, %81 : vector<8x128xf32>
    %84 = arith.divf %82, %83 : vector<8x128xf32>
    %85 = arith.mulf %76, %56 : vector<8x128xf32>
    %86 = arith.mulf %70, %78 : vector<8x128xf32>
    %87 = arith.addf %85, %86 : vector<8x128xf32>
    %88 = math.tanh %87 : vector<8x128xf32>
    %89 = arith.mulf %84, %88 : vector<8x128xf32>
    %c2_i32 = arith.constant 2 : i32
    %90 = arith.index_cast %c2_i32 : i32 to index
    %c0_31 = arith.constant 0 : index
    %c0_32 = arith.constant 0 : index
    %91 = vector.load %arg10[%90, %c0_31, %c0_32] : memref<8x8x512xf32, #tpu.memory_space<vmem>>, vector<1x8x512xf32>
    %92 = vector.shape_cast %91 : vector<1x8x512xf32> to vector<8x512xf32>
    %93 = arith.truncf %89 : vector<8x128xf32> to vector<8x128xbf16>
    %cst_33 = arith.constant dense<0.000000e+00> : vector<8x512xf32>
    %94 = tpu.matmul %93, %25, %cst_33 {dimension_numbers = #tpu.dot_dimension_numbers<[1], [0], [0], [1], [0, 0, 1, 1], [], []>} : vector<8x128xbf16>, vector<128x512xbf16>, vector<8x512xf32> -> vector<8x512xf32>
    %95 = arith.addf %92, %94 : vector<8x512xf32>
    %96 = vector.extract_strided_slice %95 {offsets = [0, 0], sizes = [8, 128], strides = [1, 1]} : vector<8x512xf32> to vector<8x128xf32>
    %97 = arith.negf %96 : vector<8x128xf32>
    %98 = math.exp %97 : vector<8x128xf32>
    %cst_34 = arith.constant 1.000000e+00 : f32
    %99 = vector.broadcast %cst_34 : f32 to vector<8x128xf32>
    %100 = arith.addf %99, %98 : vector<8x128xf32>
    %101 = arith.divf %99, %100 : vector<8x128xf32>
    %102 = vector.extract_strided_slice %95 {offsets = [0, 128], sizes = [8, 128], strides = [1, 1]} : vector<8x512xf32> to vector<8x128xf32>
    %103 = arith.negf %102 : vector<8x128xf32>
    %104 = math.exp %103 : vector<8x128xf32>
    %cst_35 = arith.constant 1.000000e+00 : f32
    %105 = vector.broadcast %cst_35 : f32 to vector<8x128xf32>
    %106 = arith.addf %105, %104 : vector<8x128xf32>
    %107 = arith.divf %105, %106 : vector<8x128xf32>
    %108 = vector.extract_strided_slice %95 {offsets = [0, 256], sizes = [8, 128], strides = [1, 1]} : vector<8x512xf32> to vector<8x128xf32>
    %109 = math.tanh %108 : vector<8x128xf32>
    %110 = vector.extract_strided_slice %95 {offsets = [0, 384], sizes = [8, 128], strides = [1, 1]} : vector<8x512xf32> to vector<8x128xf32>
    %111 = arith.negf %110 : vector<8x128xf32>
    %112 = math.exp %111 : vector<8x128xf32>
    %cst_36 = arith.constant 1.000000e+00 : f32
    %113 = vector.broadcast %cst_36 : f32 to vector<8x128xf32>
    %114 = arith.addf %113, %112 : vector<8x128xf32>
    %115 = arith.divf %113, %114 : vector<8x128xf32>
    %116 = arith.mulf %107, %87 : vector<8x128xf32>
    %117 = arith.mulf %101, %109 : vector<8x128xf32>
    %118 = arith.addf %116, %117 : vector<8x128xf32>
    %119 = math.tanh %118 : vector<8x128xf32>
    %120 = arith.mulf %115, %119 : vector<8x128xf32>
    %c3_i32 = arith.constant 3 : i32
    %121 = arith.index_cast %c3_i32 : i32 to index
    %c0_37 = arith.constant 0 : index
    %c0_38 = arith.constant 0 : index
    %122 = vector.load %arg10[%121, %c0_37, %c0_38] : memref<8x8x512xf32, #tpu.memory_space<vmem>>, vector<1x8x512xf32>
    %123 = vector.shape_cast %122 : vector<1x8x512xf32> to vector<8x512xf32>
    %124 = arith.truncf %120 : vector<8x128xf32> to vector<8x128xbf16>
    %cst_39 = arith.constant dense<0.000000e+00> : vector<8x512xf32>
    %125 = tpu.matmul %124, %25, %cst_39 {dimension_numbers = #tpu.dot_dimension_numbers<[1], [0], [0], [1], [0, 0, 1, 1], [], []>} : vector<8x128xbf16>, vector<128x512xbf16>, vector<8x512xf32> -> vector<8x512xf32>
    %126 = arith.addf %123, %125 : vector<8x512xf32>
    %127 = vector.extract_strided_slice %126 {offsets = [0, 0], sizes = [8, 128], strides = [1, 1]} : vector<8x512xf32> to vector<8x128xf32>
    %128 = arith.negf %127 : vector<8x128xf32>
    %129 = math.exp %128 : vector<8x128xf32>
    %cst_40 = arith.constant 1.000000e+00 : f32
    %130 = vector.broadcast %cst_40 : f32 to vector<8x128xf32>
    %131 = arith.addf %130, %129 : vector<8x128xf32>
    %132 = arith.divf %130, %131 : vector<8x128xf32>
    %133 = vector.extract_strided_slice %126 {offsets = [0, 128], sizes = [8, 128], strides = [1, 1]} : vector<8x512xf32> to vector<8x128xf32>
    %134 = arith.negf %133 : vector<8x128xf32>
    %135 = math.exp %134 : vector<8x128xf32>
    %cst_41 = arith.constant 1.000000e+00 : f32
    %136 = vector.broadcast %cst_41 : f32 to vector<8x128xf32>
    %137 = arith.addf %136, %135 : vector<8x128xf32>
    %138 = arith.divf %136, %137 : vector<8x128xf32>
    %139 = vector.extract_strided_slice %126 {offsets = [0, 256], sizes = [8, 128], strides = [1, 1]} : vector<8x512xf32> to vector<8x128xf32>
    %140 = math.tanh %139 : vector<8x128xf32>
    %141 = vector.extract_strided_slice %126 {offsets = [0, 384], sizes = [8, 128], strides = [1, 1]} : vector<8x512xf32> to vector<8x128xf32>
    %142 = arith.negf %141 : vector<8x128xf32>
    %143 = math.exp %142 : vector<8x128xf32>
    %cst_42 = arith.constant 1.000000e+00 : f32
    %144 = vector.broadcast %cst_42 : f32 to vector<8x128xf32>
    %145 = arith.addf %144, %143 : vector<8x128xf32>
    %146 = arith.divf %144, %145 : vector<8x128xf32>
    %147 = arith.mulf %138, %118 : vector<8x128xf32>
    %148 = arith.mulf %132, %140 : vector<8x128xf32>
    %149 = arith.addf %147, %148 : vector<8x128xf32>
    %150 = math.tanh %149 : vector<8x128xf32>
    %151 = arith.mulf %146, %150 : vector<8x128xf32>
    %c4_i32 = arith.constant 4 : i32
    %152 = arith.index_cast %c4_i32 : i32 to index
    %c0_43 = arith.constant 0 : index
    %c0_44 = arith.constant 0 : index
    %153 = vector.load %arg10[%152, %c0_43, %c0_44] : memref<8x8x512xf32, #tpu.memory_space<vmem>>, vector<1x8x512xf32>
    %154 = vector.shape_cast %153 : vector<1x8x512xf32> to vector<8x512xf32>
    %155 = arith.truncf %151 : vector<8x128xf32> to vector<8x128xbf16>
    %cst_45 = arith.constant dense<0.000000e+00> : vector<8x512xf32>
    %156 = tpu.matmul %155, %25, %cst_45 {dimension_numbers = #tpu.dot_dimension_numbers<[1], [0], [0], [1], [0, 0, 1, 1], [], []>} : vector<8x128xbf16>, vector<128x512xbf16>, vector<8x512xf32> -> vector<8x512xf32>
    %157 = arith.addf %154, %156 : vector<8x512xf32>
    %158 = vector.extract_strided_slice %157 {offsets = [0, 0], sizes = [8, 128], strides = [1, 1]} : vector<8x512xf32> to vector<8x128xf32>
    %159 = arith.negf %158 : vector<8x128xf32>
    %160 = math.exp %159 : vector<8x128xf32>
    %cst_46 = arith.constant 1.000000e+00 : f32
    %161 = vector.broadcast %cst_46 : f32 to vector<8x128xf32>
    %162 = arith.addf %161, %160 : vector<8x128xf32>
    %163 = arith.divf %161, %162 : vector<8x128xf32>
    %164 = vector.extract_strided_slice %157 {offsets = [0, 128], sizes = [8, 128], strides = [1, 1]} : vector<8x512xf32> to vector<8x128xf32>
    %165 = arith.negf %164 : vector<8x128xf32>
    %166 = math.exp %165 : vector<8x128xf32>
    %cst_47 = arith.constant 1.000000e+00 : f32
    %167 = vector.broadcast %cst_47 : f32 to vector<8x128xf32>
    %168 = arith.addf %167, %166 : vector<8x128xf32>
    %169 = arith.divf %167, %168 : vector<8x128xf32>
    %170 = vector.extract_strided_slice %157 {offsets = [0, 256], sizes = [8, 128], strides = [1, 1]} : vector<8x512xf32> to vector<8x128xf32>
    %171 = math.tanh %170 : vector<8x128xf32>
    %172 = vector.extract_strided_slice %157 {offsets = [0, 384], sizes = [8, 128], strides = [1, 1]} : vector<8x512xf32> to vector<8x128xf32>
    %173 = arith.negf %172 : vector<8x128xf32>
    %174 = math.exp %173 : vector<8x128xf32>
    %cst_48 = arith.constant 1.000000e+00 : f32
    %175 = vector.broadcast %cst_48 : f32 to vector<8x128xf32>
    %176 = arith.addf %175, %174 : vector<8x128xf32>
    %177 = arith.divf %175, %176 : vector<8x128xf32>
    %178 = arith.mulf %169, %149 : vector<8x128xf32>
    %179 = arith.mulf %163, %171 : vector<8x128xf32>
    %180 = arith.addf %178, %179 : vector<8x128xf32>
    %181 = math.tanh %180 : vector<8x128xf32>
    %182 = arith.mulf %177, %181 : vector<8x128xf32>
    %c5_i32 = arith.constant 5 : i32
    %183 = arith.index_cast %c5_i32 : i32 to index
    %c0_49 = arith.constant 0 : index
    %c0_50 = arith.constant 0 : index
    %184 = vector.load %arg10[%183, %c0_49, %c0_50] : memref<8x8x512xf32, #tpu.memory_space<vmem>>, vector<1x8x512xf32>
    %185 = vector.shape_cast %184 : vector<1x8x512xf32> to vector<8x512xf32>
    %186 = arith.truncf %182 : vector<8x128xf32> to vector<8x128xbf16>
    %cst_51 = arith.constant dense<0.000000e+00> : vector<8x512xf32>
    %187 = tpu.matmul %186, %25, %cst_51 {dimension_numbers = #tpu.dot_dimension_numbers<[1], [0], [0], [1], [0, 0, 1, 1], [], []>} : vector<8x128xbf16>, vector<128x512xbf16>, vector<8x512xf32> -> vector<8x512xf32>
    %188 = arith.addf %185, %187 : vector<8x512xf32>
    %189 = vector.extract_strided_slice %188 {offsets = [0, 0], sizes = [8, 128], strides = [1, 1]} : vector<8x512xf32> to vector<8x128xf32>
    %190 = arith.negf %189 : vector<8x128xf32>
    %191 = math.exp %190 : vector<8x128xf32>
    %cst_52 = arith.constant 1.000000e+00 : f32
    %192 = vector.broadcast %cst_52 : f32 to vector<8x128xf32>
    %193 = arith.addf %192, %191 : vector<8x128xf32>
    %194 = arith.divf %192, %193 : vector<8x128xf32>
    %195 = vector.extract_strided_slice %188 {offsets = [0, 128], sizes = [8, 128], strides = [1, 1]} : vector<8x512xf32> to vector<8x128xf32>
    %196 = arith.negf %195 : vector<8x128xf32>
    %197 = math.exp %196 : vector<8x128xf32>
    %cst_53 = arith.constant 1.000000e+00 : f32
    %198 = vector.broadcast %cst_53 : f32 to vector<8x128xf32>
    %199 = arith.addf %198, %197 : vector<8x128xf32>
    %200 = arith.divf %198, %199 : vector<8x128xf32>
    %201 = vector.extract_strided_slice %188 {offsets = [0, 256], sizes = [8, 128], strides = [1, 1]} : vector<8x512xf32> to vector<8x128xf32>
    %202 = math.tanh %201 : vector<8x128xf32>
    %203 = vector.extract_strided_slice %188 {offsets = [0, 384], sizes = [8, 128], strides = [1, 1]} : vector<8x512xf32> to vector<8x128xf32>
    %204 = arith.negf %203 : vector<8x128xf32>
    %205 = math.exp %204 : vector<8x128xf32>
    %cst_54 = arith.constant 1.000000e+00 : f32
    %206 = vector.broadcast %cst_54 : f32 to vector<8x128xf32>
    %207 = arith.addf %206, %205 : vector<8x128xf32>
    %208 = arith.divf %206, %207 : vector<8x128xf32>
    %209 = arith.mulf %200, %180 : vector<8x128xf32>
    %210 = arith.mulf %194, %202 : vector<8x128xf32>
    %211 = arith.addf %209, %210 : vector<8x128xf32>
    %212 = math.tanh %211 : vector<8x128xf32>
    %213 = arith.mulf %208, %212 : vector<8x128xf32>
    %c6_i32 = arith.constant 6 : i32
    %214 = arith.index_cast %c6_i32 : i32 to index
    %c0_55 = arith.constant 0 : index
    %c0_56 = arith.constant 0 : index
    %215 = vector.load %arg10[%214, %c0_55, %c0_56] : memref<8x8x512xf32, #tpu.memory_space<vmem>>, vector<1x8x512xf32>
    %216 = vector.shape_cast %215 : vector<1x8x512xf32> to vector<8x512xf32>
    %217 = arith.truncf %213 : vector<8x128xf32> to vector<8x128xbf16>
    %cst_57 = arith.constant dense<0.000000e+00> : vector<8x512xf32>
    %218 = tpu.matmul %217, %25, %cst_57 {dimension_numbers = #tpu.dot_dimension_numbers<[1], [0], [0], [1], [0, 0, 1, 1], [], []>} : vector<8x128xbf16>, vector<128x512xbf16>, vector<8x512xf32> -> vector<8x512xf32>
    %219 = arith.addf %216, %218 : vector<8x512xf32>
    %220 = vector.extract_strided_slice %219 {offsets = [0, 0], sizes = [8, 128], strides = [1, 1]} : vector<8x512xf32> to vector<8x128xf32>
    %221 = arith.negf %220 : vector<8x128xf32>
    %222 = math.exp %221 : vector<8x128xf32>
    %cst_58 = arith.constant 1.000000e+00 : f32
    %223 = vector.broadcast %cst_58 : f32 to vector<8x128xf32>
    %224 = arith.addf %223, %222 : vector<8x128xf32>
    %225 = arith.divf %223, %224 : vector<8x128xf32>
    %226 = vector.extract_strided_slice %219 {offsets = [0, 128], sizes = [8, 128], strides = [1, 1]} : vector<8x512xf32> to vector<8x128xf32>
    %227 = arith.negf %226 : vector<8x128xf32>
    %228 = math.exp %227 : vector<8x128xf32>
    %cst_59 = arith.constant 1.000000e+00 : f32
    %229 = vector.broadcast %cst_59 : f32 to vector<8x128xf32>
    %230 = arith.addf %229, %228 : vector<8x128xf32>
    %231 = arith.divf %229, %230 : vector<8x128xf32>
    %232 = vector.extract_strided_slice %219 {offsets = [0, 256], sizes = [8, 128], strides = [1, 1]} : vector<8x512xf32> to vector<8x128xf32>
    %233 = math.tanh %232 : vector<8x128xf32>
    %234 = vector.extract_strided_slice %219 {offsets = [0, 384], sizes = [8, 128], strides = [1, 1]} : vector<8x512xf32> to vector<8x128xf32>
    %235 = arith.negf %234 : vector<8x128xf32>
    %236 = math.exp %235 : vector<8x128xf32>
    %cst_60 = arith.constant 1.000000e+00 : f32
    %237 = vector.broadcast %cst_60 : f32 to vector<8x128xf32>
    %238 = arith.addf %237, %236 : vector<8x128xf32>
    %239 = arith.divf %237, %238 : vector<8x128xf32>
    %240 = arith.mulf %231, %211 : vector<8x128xf32>
    %241 = arith.mulf %225, %233 : vector<8x128xf32>
    %242 = arith.addf %240, %241 : vector<8x128xf32>
    %243 = math.tanh %242 : vector<8x128xf32>
    %244 = arith.mulf %239, %243 : vector<8x128xf32>
    %c7_i32 = arith.constant 7 : i32
    %245 = arith.index_cast %c7_i32 : i32 to index
    %c0_61 = arith.constant 0 : index
    %c0_62 = arith.constant 0 : index
    %246 = vector.load %arg10[%245, %c0_61, %c0_62] : memref<8x8x512xf32, #tpu.memory_space<vmem>>, vector<1x8x512xf32>
    %247 = vector.shape_cast %246 : vector<1x8x512xf32> to vector<8x512xf32>
    %248 = arith.truncf %244 : vector<8x128xf32> to vector<8x128xbf16>
    %cst_63 = arith.constant dense<0.000000e+00> : vector<8x512xf32>
    %249 = tpu.matmul %248, %25, %cst_63 {dimension_numbers = #tpu.dot_dimension_numbers<[1], [0], [0], [1], [0, 0, 1, 1], [], []>} : vector<8x128xbf16>, vector<128x512xbf16>, vector<8x512xf32> -> vector<8x512xf32>
    %250 = arith.addf %247, %249 : vector<8x512xf32>
    %251 = vector.extract_strided_slice %250 {offsets = [0, 0], sizes = [8, 128], strides = [1, 1]} : vector<8x512xf32> to vector<8x128xf32>
    %252 = arith.negf %251 : vector<8x128xf32>
    %253 = math.exp %252 : vector<8x128xf32>
    %cst_64 = arith.constant 1.000000e+00 : f32
    %254 = vector.broadcast %cst_64 : f32 to vector<8x128xf32>
    %255 = arith.addf %254, %253 : vector<8x128xf32>
    %256 = arith.divf %254, %255 : vector<8x128xf32>
    %257 = vector.extract_strided_slice %250 {offsets = [0, 128], sizes = [8, 128], strides = [1, 1]} : vector<8x512xf32> to vector<8x128xf32>
    %258 = arith.negf %257 : vector<8x128xf32>
    %259 = math.exp %258 : vector<8x128xf32>
    %cst_65 = arith.constant 1.000000e+00 : f32
    %260 = vector.broadcast %cst_65 : f32 to vector<8x128xf32>
    %261 = arith.addf %260, %259 : vector<8x128xf32>
    %262 = arith.divf %260, %261 : vector<8x128xf32>
    %263 = vector.extract_strided_slice %250 {offsets = [0, 256], sizes = [8, 128], strides = [1, 1]} : vector<8x512xf32> to vector<8x128xf32>
    %264 = math.tanh %263 : vector<8x128xf32>
    %265 = vector.extract_strided_slice %250 {offsets = [0, 384], sizes = [8, 128], strides = [1, 1]} : vector<8x512xf32> to vector<8x128xf32>
    %266 = arith.negf %265 : vector<8x128xf32>
    %267 = math.exp %266 : vector<8x128xf32>
    %cst_66 = arith.constant 1.000000e+00 : f32
    %268 = vector.broadcast %cst_66 : f32 to vector<8x128xf32>
    %269 = arith.addf %268, %267 : vector<8x128xf32>
    %270 = arith.divf %268, %269 : vector<8x128xf32>
    %271 = arith.mulf %262, %242 : vector<8x128xf32>
    %272 = arith.mulf %256, %264 : vector<8x128xf32>
    %273 = arith.addf %271, %272 : vector<8x128xf32>
    %274 = math.tanh %273 : vector<8x128xf32>
    %275 = arith.mulf %270, %274 : vector<8x128xf32>
    %c8_i32 = arith.constant 8 : i32
    %c0_67 = arith.constant 0 : index
    %c0_68 = arith.constant 0 : index
    %276 = vector.load %arg7[%c0_67, %c0_68] : memref<128x128xf32, #tpu.memory_space<vmem>>, vector<128x128xf32>
    %cst_69 = arith.constant dense<0.000000e+00> : vector<8x128xf32>
    %277 = tpu.matmul %275, %276, %cst_69 {dimension_numbers = #tpu.dot_dimension_numbers<[1], [0], [0], [1], [0, 0, 1, 1], [], []>} : vector<8x128xf32>, vector<128x128xf32>, vector<8x128xf32> -> vector<8x128xf32>
    %c0_70 = arith.constant 0 : index
    %c0_71 = arith.constant 0 : index
    %278 = vector.load %arg8[%c0_70, %c0_71] : memref<1x128xf32, #tpu.memory_space<vmem>>, vector<1x128xf32>
    %279 = vector.broadcast %278 : vector<1x128xf32> to vector<8x128xf32>
    %280 = arith.addf %277, %279 : vector<8x128xf32>
    %c0_72 = arith.constant 0 : index
    %c0_73 = arith.constant 0 : index
    %281 = vector.load %arg9[%c0_72, %c0_73] : memref<8x128xf32, #tpu.memory_space<vmem>>, vector<8x128xf32>
    tpu.vector_store %arg9[%c0_72, %c0_73], %280 {strides = array<i32>} : memref<8x128xf32, #tpu.memory_space<vmem>>, vector<8x128xf32>,
    return
  }
  func.func @transform_0(%arg0: i32) -> (i32, i32, i32) {
    %c0_i32 = arith.constant 0 : i32
    %c0_i32_0 = arith.constant 0 : i32
    %c0_i32_1 = arith.constant 0 : i32
    %c0_i32_2 = arith.constant 0 : i32
    return %c0_i32, %c0_i32_0, %c0_i32_1 : i32, i32, i32
  }
  func.func @transform_1(%arg0: i32) -> (i32, i32) {
    %c0_i32 = arith.constant 0 : i32
    %c0_i32_0 = arith.constant 0 : i32
    %c0_i32_1 = arith.constant 0 : i32
    return %c0_i32, %c0_i32_0 : i32, i32
  }
  func.func @transform_2(%arg0: i32) -> (i32, i32) {
    %c0_i32 = arith.constant 0 : i32
    %c0_i32_0 = arith.constant 0 : i32
    %c0_i32_1 = arith.constant 0 : i32
    return %c0_i32, %c0_i32_0 : i32, i32
  }
  func.func @transform_3(%arg0: i32) -> (i32, i32) {
    %c0_i32 = arith.constant 0 : i32
    %c0_i32_0 = arith.constant 0 : i32
    %c0_i32_1 = arith.constant 0 : i32
    return %c0_i32, %c0_i32_0 : i32, i32
  }
  func.func @transform_4(%arg0: i32) -> (i32, i32) {
    %c0_i32 = arith.constant 0 : i32
    %c0_i32_0 = arith.constant 0 : i32
    %c0_i32_1 = arith.constant 0 : i32
    return %c0_i32, %c0_i32_0 : i32, i32
  }
  func.func @transform_5(%arg0: i32) -> (i32, i32) {
    %c0_i32 = arith.constant 0 : i32
    %c0_i32_0 = arith.constant 0 : i32
    %c0_i32_1 = arith.constant 0 : i32
    return %c0_i32, %c0_i32_0 : i32, i32
  }
  func.func @transform_6(%arg0: i32) -> (i32, i32) {
    %c0_i32 = arith.constant 0 : i32
    %c0_i32_0 = arith.constant 0 : i32
    %c0_i32_1 = arith.constant 0 : i32
    return %c0_i32, %c0_i32_0 : i32, i32
  }
  func.func @transform_7(%arg0: i32) -> (i32, i32) {
    %c0_i32 = arith.constant 0 : i32
    %c0_i32_0 = arith.constant 0 : i32
    %c0_i32_1 = arith.constant 0 : i32
    return %c0_i32, %c0_i32_0 : i32, i32
  }
  func.func @transform_8(%arg0: i32) -> (i32, i32) {
    %c0_i32 = arith.constant 0 : i32
    %c0_i32_0 = arith.constant 0 : i32
    %c0_i32_1 = arith.constant 0 : i32
    return %c0_i32, %c0_i32_0 : i32, i32
  }
}

</mosaic_0001>

<bundles_post_ra>
// kernel: tpu_custom_call.1
= control target key start
LH: loop header
LB: loop body
LE: loop exit
PB: predicated region body
PF: predicated region fallthrough
CT: control target
= control target key end

     0   :  { %13 = vsyncpa [#allocation4], 0  ;;  %s3121_s0 = inlined_call_operand.hbm [shape: f32[16,8,48], index: 0, kind: input, shape index: {}]   ;;  %s3122_s1 = inlined_call_operand.hbm [shape: bf16[48,64], index: 1, kind: input, shape index: {}]   ;;  %s3123_s2 = inlined_call_operand.vmem [shape: f32[1,64], index: 2, kind: input, shape index: {}]   ;;  %s3124_s3 = inlined_call_operand.hbm [shape: bf16[64,512], index: 3, kind: input, shape index: {}]   ;;  %s3125_s4 = inlined_call_operand.hbm [shape: bf16[128,512], index: 4, kind: input, shape index: {}]   ;;  %s3126_s5 = inlined_call_operand.vmem [shape: f32[1,512], index: 5, kind: input, shape index: {}]   ;;  %s3127_s6 = inlined_call_operand.hbm [shape: f32[128,128], index: 6, kind: input, shape index: {}]   ;;  %s3128_s7 = inlined_call_operand.vmem [shape: f32[1,128], index: 7, kind: input, shape index: {}]   ;;  %s3129_s8 = inlined_call_operand.hbm [shape: f32[8,128], index: 8, kind: output, shape index: {}]  }
   0x1   :  { %14 = vsyncpa [#allocation7], 0 }
   0x2   :  { %15 = vsyncpa [#allocation10], 0 }
   0x3   :  { %16 = vsyncpa [#allocation5], 0  ;;  %s2435_s27 = smov [#allocation6]   ;;  %s2295_s9 = scalar_lea.hbm %s3122_s1, 384 }
   0x4   :  { %s34_s28 = sshll.u32 %s2435_s27, 4  ;;  %p2296_p0 = scmp.ne.s32.totalorder %s3122_s1, %s2295_s9  ;;  %s35_s28 = int_to_ptr.vmem [resolvable:$true] %s34_s28 }
   0x5   :  { %p2299_p1 = scmp.lt.u32.totalorder %s2295_s9, %s3122_s1 }
   0x7   :  { %p2301_p2 = pnand %p2299_p1, %p2296_p0 }
   0x9   :  { %2304 = shalt.err (!%p2301_p2)
}
   0xa   :  { %s2305_s14 = scalar_lea.vmem %s35_s28, 384  ;;  %p2310_p4 = scmp.lt.s32.totalorder %s35_s28, %s35_s28 }
   0xb   :  { %p2306_p3 = scmp.ne.s32.totalorder %s35_s28, %s2305_s14  ;;  %p2311_p5 = scmp.lt.s32.totalorder %s2305_s14, %s2305_s14 }
   0xd   :  { %p2312_p6 = por %p2311_p5, %p2310_p4 }
   0xf   :  { %p2313_p7 = pnand %p2312_p6, %p2306_p3 }
  0x11   :  { %2316 = shalt.err (!%p2313_p7)
}
  0x12   :  { %s2436_s15 = smov 64   ;;  %s2437_s16 = smov 4  }
  0x13   :  { %40 = dma.hbm_to_vmem [thread:$0]  %s3122_s1, 384, %s35_s28, [#allocation7], %s2436_s15, %s2436_s15, %s2437_s16  }
  0x14   :  { %s2438_s19 = smov [#allocation9]   ;;  %s2439_s21 = smov [#allocation3]  }
  0x15   :  { %s60_s20 = sshll.u32 %s2438_s19, 4  ;;  %s22_s22 = sshll.u32 %s2439_s21, 4  ;;  %s61_s20 = int_to_ptr.vmem [resolvable:$true] %s60_s20  ;;  %s23_s22 = int_to_ptr.vmem [resolvable:$true] %s22_s22 }
  0x16   :  { %s2317_s25 = scalar_lea.hbm %s3125_s4, 4096 }
  0x17   :  { %p2318_p8 = scmp.ne.s32.totalorder %s3125_s4, %s2317_s25  ;;  %p2321_p9 = scmp.lt.u32.totalorder %s2317_s25, %s3125_s4 }
  0x19   :  { %p2323_p10 = pnand %p2321_p9, %p2318_p8 }
  0x1b   :  { %2326 = shalt.err (!%p2323_p10)
}
  0x1c   :  { %s2327_s1 = scalar_lea.vmem %s61_s20, 4096  ;;  %p2332_p12 = scmp.lt.s32.totalorder %s61_s20, %s61_s20 }
  0x1d   :  { %p2328_p11 = scmp.ne.s32.totalorder %s61_s20, %s2327_s1  ;;  %p2333_p13 = scmp.lt.s32.totalorder %s2327_s1, %s2327_s1 }
  0x1f   :  { %p2334_p0 = por %p2333_p13, %p2332_p12 }
  0x21   :  { %p2335_p1 = pnand %p2334_p0, %p2328_p11 }
  0x23   :  { %2338 = shalt.err (!%p2335_p1)
}
  0x24   :  { %s2440_s28 = smov 256   ;;  %s2441_s9 = smov 16  }
  0x25   :  { %66 = dma.hbm_to_vmem [thread:$0]  %s3125_s4, 4096, %s61_s20, [#allocation10], %s2440_s28, %s2440_s28, %s2441_s9  }
  0x26   :  { %s2339_s14 = scalar_lea.hbm %s3121_s0, 2048 }
  0x27   :  { %p2340_p2 = scmp.ne.s32.totalorder %s3121_s0, %s2339_s14  ;;  %p2343_p3 = scmp.lt.u32.totalorder %s2339_s14, %s3121_s0 }
  0x29   :  { %p2345_p4 = pnand %p2343_p3, %p2340_p2 }
  0x2b   :  { %2348 = shalt.err (!%p2345_p4)
}
  0x2c   :  { %s2349_s19 = scalar_lea.vmem %s23_s22, 2048  ;;  %p2354_p6 = scmp.lt.s32.totalorder %s23_s22, %s23_s22 }
  0x2d   :  { %p2350_p5 = scmp.ne.s32.totalorder %s23_s22, %s2349_s19  ;;  %p2355_p7 = scmp.lt.s32.totalorder %s2349_s19, %s2349_s19 }
  0x2f   :  { %p2356_p8 = por %p2355_p7, %p2354_p6 }
  0x31   :  { %p2357_p9 = pnand %p2356_p8, %p2350_p5 }
  0x33   :  { %2360 = shalt.err (!%p2357_p9)
}
  0x34   :  { %s2442_s4 = smov 128   ;;  %s2443_s20 = smov 8  }
  0x35   :  { %28 = dma.hbm_to_vmem [thread:$0]  %s3121_s0, 2048, %s23_s22, [#allocation4], %s2442_s4, %s2442_s4, %s2443_s20  }
  0x36   :  { %s2444_s24 = smov [#allocation8]   ;;  %s2445_s26 = smov [#allocation11]  }
  0x37   :  { %s48_s25 = sshll.u32 %s2444_s24, 4  ;;  %s74_s27 = sshll.u32 %s2445_s26, 4  ;;  %s49_s25 = int_to_ptr.vmem [resolvable:$true] %s48_s25  ;;  %s75_s27 = int_to_ptr.vmem [resolvable:$true] %s74_s27 }
  0x38   :  { %s2361_s1 = scalar_lea.hbm %s3124_s3, 2048 }
  0x39   :  { %p2362_p10 = scmp.ne.s32.totalorder %s3124_s3, %s2361_s1  ;;  %p2365_p11 = scmp.lt.u32.totalorder %s2361_s1, %s3124_s3 }
  0x3b   :  { %p2367_p12 = pnand %p2365_p11, %p2362_p10 }
  0x3d   :  { %2370 = shalt.err (!%p2367_p12)
}
  0x3e   :  { %s2371_s0 = scalar_lea.vmem %s49_s25, 2048  ;;  %p2376_p0 = scmp.lt.s32.totalorder %s49_s25, %s49_s25 }
  0x3f   :  { %p2372_p13 = scmp.ne.s32.totalorder %s49_s25, %s2371_s0  ;;  %p2377_p1 = scmp.lt.s32.totalorder %s2371_s0, %s2371_s0 }
  0x41   :  { %p2378_p2 = por %p2377_p1, %p2376_p0 }
  0x43   :  { %p2379_p3 = pnand %p2378_p2, %p2372_p13 }
  0x45   :  { %2382 = shalt.err (!%p2379_p3)
}
  0x46   :  { %54 = dma.hbm_to_vmem [thread:$0]  %s3124_s3, 2048, %s49_s25, [#allocation7], %s2440_s28, %s2440_s28, %s2441_s9  }
  0x47   :  { %s2383_s17 = scalar_lea.hbm %s3127_s6, 2048 }
  0x48   :  { %p2384_p4 = scmp.ne.s32.totalorder %s3127_s6, %s2383_s17  ;;  %p2387_p5 = scmp.lt.u32.totalorder %s2383_s17, %s3127_s6 }
  0x4a   :  { %p2389_p6 = pnand %p2387_p5, %p2384_p4 }
  0x4c   :  { %2392 = shalt.err (!%p2389_p6)
}
  0x4d   :  { %s2393_s24 = scalar_lea.vmem %s75_s27, 2048  ;;  %p2398_p8 = scmp.lt.s32.totalorder %s75_s27, %s75_s27 }
  0x4e   :  { %p2394_p7 = scmp.ne.s32.totalorder %s75_s27, %s2393_s24  ;;  %p2399_p9 = scmp.lt.s32.totalorder %s2393_s24, %s2393_s24 }
  0x50   :  { %p2400_p10 = por %p2399_p9, %p2398_p8 }
  0x52   :  { %p2401_p11 = pnand %p2400_p10, %p2394_p7 }
  0x54   :  { %2404 = shalt.err (!%p2401_p11)
}
  0x55   :  { %80 = dma.hbm_to_vmem [thread:$0]  %s3127_s6, 2048, %s75_s27, [#allocation10], %s2442_s4, %s2442_s4, %s2443_s20  }
  0x56   :  { %2427 = dma.done.wait [#allocation4], 2048  }
  0x57   :  { %2428 = vsyncadd [#allocation4], 4294965248 }
  0x58   :  { %2429 = dma.done.wait [#allocation7], 2432  }
  0x59   :  { %2430 = vsyncadd [#allocation7], 4294964864 }
  0x5a   :  { %2431 = dma.done.wait [#allocation10], 6144  }
  0x5b   :  { %2432 = vsyncadd [#allocation10], 4294961152  ;;  %v2060_v0 = vld [vmem:[#allocation6] sm:$0xff]   ;;  %v2061_v1 = vld [vmem:[#allocation6 + $0x8] sm:$0xff]   ;;  %vm154_vm0 = vcmask 392192   ;;  %v3130_v45 = vmov 0  }
  0x5c   :  { %1963 = vmatprep.subr.bf16.mxu0 %v2060_v0  ;;  %v99_v2 = vld [vmem:[#allocation3] sm:$0xff]  ;;  %v100_v3 = vld [vmem:[#allocation3 + $0x8] sm:$0xff]  ;;  %v2062_v4 = vld [vmem:[#allocation6 + $0x10] sm:$0xff]   ;;  %467 = vmatprep.mubr.bf16.mxu1 %v3130_v45  ;;  %vm422_vm1 = vcmask 523264   ;;  %vm2448_vm2 = vmmov 0   ;;  %s2450_s25 = smov [#allocation12]  }
  0x5d   :  { %1964 = vmatpush3.bf16.msra.mxu0 %v2060_v0  ;;  %v115_v5 = vpack.c.bf16 %v100_v3, %v99_v2  ;;  %v101_v6 = vld [vmem:[#allocation3 + $0x10] sm:$0xff]  ;;  %v102_v7 = vld [vmem:[#allocation3 + $0x18] sm:$0xff]  ;;  %v103_v8 = vld [vmem:[#allocation3 + $0x20] sm:$0xff]  ;;  %s1831_s26 = sshll.u32 %s2450_s25, 4  ;;  %s1832_s26 = int_to_ptr.vmem [resolvable:$true] %s1831_s26 }
  0x5e   :  { %1965 = vmatprep.subr.bf16.mxu0 %v2061_v1  ;;  %v104_v9 = vld [vmem:[#allocation3 + $0x28] sm:$0xff]  ;;  %v2063_v10 = vld [vmem:[#allocation8 + $0x8] ss:$16 sps:$4 sm:$0xff]   ;;  %v2065_v11 = vld [vmem:[#allocation8 + $0xc] ss:$16 sps:$4 sm:$0xff]   ;;  %v116_v12 = vpack.c.bf16 %v102_v7, %v101_v6  ;;  %s2405_s27 = scalar_lea.vmem %s1832_s26, 128  ;;  %p2410_p13 = scmp.lt.s32.totalorder %s1832_s26, %s1832_s26 }
  0x5f   :  { %1969 = vmatprep.mubr.msk.bf16.mxu0 %vm154_vm0, %v115_v5  ;;  %v2066_v13 = vld [vmem:[#allocation8 + $0x4] ss:$16 sps:$4 sm:$0xff]   ;;  %v2068_v14 = vld [vmem:[#allocation8] ss:$16 sps:$4 sm:$0xff]   ;;  %v117_v15 = vpack.c.bf16 %v104_v9, %v103_v8  ;;  %v105_v17 = vld [vmem:[#allocation3 + $0x30] sm:$0xff]  ;;  %p2406_p12 = scmp.ne.s32.totalorder %s1832_s26, %s2405_s27  ;;  %p2411_p0 = scmp.lt.s32.totalorder %s2405_s27, %s2405_s27 }
  0x60   :  { %v2069_v16 = vld [vmem:[#allocation8 + $0x24] ss:$16 sps:$4 sm:$0xff]   ;;  %435 = vmatprep.subr.bf16.mxu1 %v2066_v13  ;;  %v107_v19 = vld [vmem:[#allocation3 + $0x40] sm:$0xff]  ;;  %v109_v23 = vld [vmem:[#allocation3 + $0x50] sm:$0xff] }
  0x61   :  { %1966 = vmatpush3.bf16.msra.mxu0 %v2061_v1  ;;  %v106_v18 = vld [vmem:[#allocation3 + $0x38] sm:$0xff]  ;;  %436 = vmatpush1.bf16.msra.mxu1 %v2068_v14  ;;  %v108_v20 = vld [vmem:[#allocation3 + $0x48] sm:$0xff]  ;;  %v111_v25 = vld [vmem:[#allocation3 + $0x60] sm:$0xff]  ;;  %p2412_p1 = por %p2411_p0, %p2410_p13 }
  0x62   :  { %1967 = vmatprep.subr.bf16.mxu0 %v2062_v4  ;;  %437 = vmatprep.subr.bf16.mxu1 %v2069_v16  ;;  %v118_v21 = vpack.c.bf16 %v106_v18, %v105_v17  ;;  %v119_v22 = vpack.c.bf16 %v108_v20, %v107_v19  ;;  %v110_v24 = vld [vmem:[#allocation3 + $0x58] sm:$0xff]  ;;  %v112_v26 = vld [vmem:[#allocation3 + $0x68] sm:$0xff]  ;;  %v113_v29 = vld [vmem:[#allocation3 + $0x70] sm:$0xff] }
  0x63   :  { %v120_v27 = vpack.c.bf16 %v110_v24, %v109_v23  ;;  %v121_v28 = vpack.c.bf16 %v112_v26, %v111_v25  ;;  %v114_v30 = vld [vmem:[#allocation3 + $0x78] sm:$0xff]  ;;  %v2074_v32 = vld [vmem:[#allocation8 + $0x2c] ss:$16 sps:$4 sm:$0xff]   ;;  %v2072_v34 = vld [vmem:[#allocation8 + $0x28] ss:$16 sps:$4 sm:$0xff]   ;;  %p2413_p2 = pnand %p2412_p1, %p2406_p12 }
  0x64   :  { %v122_v31 = vpack.c.bf16 %v114_v30, %v113_v29  ;;  %v2071_v33 = vld [vmem:[#allocation8 + $0x20] ss:$16 sps:$4 sm:$0xff]   ;;  %v2075_v35 = vld [vmem:[#allocation8 + $0x44] ss:$16 sps:$4 sm:$0xff]   ;;  %v2080_v36 = vld [vmem:[#allocation8 + $0x4c] ss:$16 sps:$4 sm:$0xff]  }
  0x65   :  { %1968 = vmatpush3.bf16.msra.mxu0 %v2062_v4  ;;  %438 = vmatpush1.bf16.msra.mxu1 %v2071_v33  ;;  %v2077_v37 = vld [vmem:[#allocation8 + $0x40] ss:$16 sps:$4 sm:$0xff]   ;;  %v2078_v38 = vld [vmem:[#allocation8 + $0x48] ss:$16 sps:$4 sm:$0xff]   ;;  %v2081_v39 = vld [vmem:[#allocation8 + $0x64] ss:$16 sps:$4 sm:$0xff]  }
  0x66   :  { %508 = vmatprep.subr.bf16.mxu0 %v2065_v11  ;;  %439 = vmatprep.subr.bf16.mxu1 %v2075_v35  ;;  %v2086_v40 = vld [vmem:[#allocation8 + $0x6c] ss:$16 sps:$4 sm:$0xff]   ;;  %v2083_v41 = vld [vmem:[#allocation8 + $0x60] ss:$16 sps:$4 sm:$0xff]   ;;  %v2084_v42 = vld [vmem:[#allocation8 + $0x68] ss:$16 sps:$4 sm:$0xff]  }
  0x67   :  { %v2576_v43 = vld [vmem:[#allocation9 + $0x4] ss:$16 sps:$4 sm:$0xff]   ;;  %v2578_v44 = vld [vmem:[#allocation9 + $0xc] ss:$16 sps:$4 sm:$0xff]   ;;  %v2587_v46 = vld [vmem:[%s3123_s2] ss:$0 sm:$0xff] }
  0x68   :  { %1970 = vmatmul.mubr.msk.bf16.vlgmr.msra.gmra.mrb[0].mxu0 %vm154_vm0, %v116_v12  ;;  %v2594_v0 = vld [vmem:[#allocation9] ss:$16 sps:$4 sm:$0xff]   ;;  %v2596_v1 = vld [vmem:[#allocation9 + $0x8] ss:$16 sps:$4 sm:$0xff]   ;;  %v2599_v5 = vld [vmem:[#allocation9 + $0x24] ss:$16 sps:$4 sm:$0xff]  }
  0x69   :  { %1973 = vmatprep.mubr.msk.bf16.mxu0 %vm154_vm0, %v117_v15  ;;  %509 = vmatpush1.bf16.msra.mxu0 %v2063_v10  ;;  %v2601_v6 = vld [vmem:[#allocation9 + $0x2c] ss:$16 sps:$4 sm:$0xff]   ;;  %v2609_v12 = vld [vmem:[#allocation9 + $0x20] ss:$16 sps:$4 sm:$0xff]   ;;  %v2611_v13 = vld [vmem:[#allocation9 + $0x28] ss:$16 sps:$4 sm:$0xff]  }
  0x6a   :  { %510 = vmatprep.subr.bf16.mxu0 %v2074_v32  ;;  %440 = vmatpush1.bf16.msra.mxu1 %v2077_v37  ;;  %v2615_v16 = vld [vmem:[#allocation9 + $0x44] ss:$16 sps:$4 sm:$0xff]   ;;  %v2617_v17 = vld [vmem:[#allocation9 + $0x4c] ss:$16 sps:$4 sm:$0xff]   ;;  %v2624_v23 = vld [vmem:[#allocation9 + $0x40] ss:$16 sps:$4 sm:$0xff]  }
  0x6b   :  { %441 = vmatprep.subr.bf16.mxu1 %v2081_v39  ;;  %v2626_v24 = vld [vmem:[#allocation9 + $0x48] ss:$16 sps:$4 sm:$0xff]   ;;  %v2633_v29 = vld [vmem:[#allocation9 + $0x6c] ss:$16 sps:$4 sm:$0xff]   ;;  %v2641_v35 = vld [vmem:[#allocation9 + $0x60] ss:$16 sps:$4 sm:$0xff]  }
  0x6c   :  { %v2647_v39 = vld [vmem:[#allocation9 + $0x84] ss:$16 sps:$4 sm:$0xff]  }
  0x6d   :  { %511 = vmatpush1.bf16.msra.mxu0 %v2072_v34 }
  0x6e   :  { %512 = vmatprep.subr.bf16.mxu0 %v2080_v36  ;;  %442 = vmatpush1.bf16.msra.mxu1 %v2083_v41  ;;  %v2643_v36 = vld [vmem:[#allocation9 + $0x68] ss:$16 sps:$4 sm:$0xff]  }
  0x6f   :  { %809 = vmatprep.subr.bf16.mxu1 %v2576_v43 }
  0x70   :  { %1974 = vmatmul.mubr.msk.bf16.gmra.mrb[4].mxu0 %vm154_vm0, %v118_v21 }
  0x71   :  { %1977 = vmatprep.mubr.msk.bf16.mxu0 %vm154_vm0, %v119_v22  ;;  %513 = vmatpush1.bf16.msra.mxu0 %v2078_v38 }
  0x72   :  { %514 = vmatprep.subr.bf16.mxu0 %v2086_v40  ;;  %v2649_v40 = vld [vmem:[#allocation9 + $0x8c] ss:$16 sps:$4 sm:$0xff]  }
  0x75   :  { %515 = vmatpush1.bf16.msra.mxu0 %v2084_v42 }
  0x76   :  { %850 = vmatprep.subr.bf16.mxu0 %v2578_v44 }
  0x78   :  { %1978 = vmatmul.mubr.msk.bf16.gmra.mrb[8].mxu0 %vm154_vm0, %v120_v27 }
  0x79   :  { %1981 = vmatprep.mubr.msk.bf16.mxu0 %vm154_vm0, %v121_v28  ;;  %v2631_v28 = vld [vmem:[#allocation9 + $0x64] ss:$16 sps:$4 sm:$0xff]  }
  0x80   :  { %1982 = vmatmul.mubr.msk.bf16.gmra.mrb[12].mxu0 %vm154_vm0, %v122_v31 }
  0x81   :  { %540 = vmatprep.mubr.bf16.mxu0 %v3130_v45 }
 0x13b   :  { %v1971_v47 = vpop.f32.mrb[0].mxu0 }
 0x13c   :  { %v222_v48 = vadd.f32 %v1971_v47, %v2587_v46  ;;  %v213_v49 = vpop.f32.mrb[1].mxu0 }
 0x13d   :  { %v214_v50 = vadd.f32 %v2587_v46, %v213_v49  ;;  %v1972_v51 = vpop.f32.mrb[2].mxu0 }
 0x13e   :  { %v225_v52 = vadd.f32 %v1972_v51, %v2587_v46  ;;  %v216_v53 = vpop.f32.mrb[3].mxu0  ;;  %v278_v55 = vmax.f32 %v222_v48, 0.0  ;;  %v2658_v51 = vld [vmem:[#allocation9 + $0x88] ss:$16 sps:$4 sm:$0xff]  }
 0x13f   :  { %v217_v54 = vadd.f32 %v2587_v46, %v216_v53  ;;  %v276_v57 = vmax.f32 %v214_v50, 0.0  ;;  %v2656_v50 = vld [vmem:[#allocation9 + $0x80] ss:$16 sps:$4 sm:$0xff]  }
 0x140   :  { %v279_v56 = vmax.f32 %v225_v52, 0.0 }
 0x141   :  { %v277_v58 = vmax.f32 %v217_v54, 0.0 }
 0x142   :  { %v293_v59 = vmax.f32 %v278_v55, %v279_v56  ;;  %v2663_v55 = vld [vmem:[#allocation9 + $0xa4] ss:$16 sps:$4 sm:$0xff]   ;;  %v2665_v56 = vld [vmem:[#allocation9 + $0xac] ss:$16 sps:$4 sm:$0xff]  }
 0x143   :  { %v292_v60 = vmax.f32 %v276_v57, %v277_v58  ;;  %v1975_v61 = vpop.f32.mrb[4].mxu0 }
 0x144   :  { %v238_v62 = vadd.f32 %v1975_v61, %v2587_v46  ;;  %v229_v63 = vpop.f32.mrb[5].mxu0 }
 0x145   :  { %v300_v2 = vpack.c.bf16 %v293_v59, %v292_v60  ;;  %v230_v3 = vadd.f32 %v2587_v46, %v229_v63  ;;  %v1976_v4 = vpop.f32.mrb[6].mxu0  ;;  %v2675_v63 = vld [vmem:[#allocation9 + $0xa8] ss:$16 sps:$4 sm:$0xff]  }
 0x146   :  { %v241_v7 = vadd.f32 %v1976_v4, %v2587_v46  ;;  %v232_v8 = vpop.f32.mrb[7].mxu0  ;;  %v282_v10 = vmax.f32 %v238_v62, 0.0  ;;  %v2673_v62 = vld [vmem:[#allocation9 + $0xa0] ss:$16 sps:$4 sm:$0xff]   ;;  %v2681_v4 = vld [vmem:[#allocation9 + $0xcc] ss:$16 sps:$4 sm:$0xff]  }
 0x147   :  { %v233_v9 = vadd.f32 %v2587_v46, %v232_v8  ;;  %1870 = vmatmul.mubr.msk.bf16.vlgmr.msra.gmra.mrb[0].mxu1 %vm422_vm1, %v300_v2  ;;  %1874 = vmatmul.mubr.msk.bf16.vlgmr.msra.gmra.mrb[16].mxu0 %vm422_vm1, %v300_v2  ;;  %v280_v14 = vmax.f32 %v230_v3, 0.0 }
 0x148   :  { %v283_v11 = vmax.f32 %v241_v7, 0.0  ;;  %810 = vmatpush1.bf16.msra.mxu1 %v2594_v0  ;;  %851 = vmatpush1.bf16.msra.mxu0 %v2596_v1 }
 0x149   :  { %v281_v15 = vmax.f32 %v233_v9, 0.0  ;;  %811 = vmatprep.subr.bf16.mxu1 %v2599_v5  ;;  %852 = vmatprep.subr.bf16.mxu0 %v2601_v6  ;;  %v2687_v9 = vld [vmem:[#allocation9 + $0xc0] ss:$16 sps:$4 sm:$0xff]  }
 0x14a   :  { %v295_v18 = vmax.f32 %v282_v10, %v283_v11  ;;  %477 = vmatprep.mubr.bf16.mxu1 %v3130_v45  ;;  %550 = vmatprep.mubr.bf16.mxu0 %v3130_v45  ;;  %v2689_v10 = vld [vmem:[#allocation9 + $0xc8] ss:$16 sps:$4 sm:$0xff]  }
 0x14b   :  { %v294_v19 = vmax.f32 %v280_v14, %v281_v15  ;;  %v1979_v20 = vpop.f32.mrb[8].mxu0  ;;  %v2693_v14 = vld [vmem:[#allocation9 + $0xe4] ss:$16 sps:$4 sm:$0xff]   ;;  %v2695_v15 = vld [vmem:[#allocation9 + $0xec] ss:$16 sps:$4 sm:$0xff]  }
 0x14c   :  { %v254_v21 = vadd.f32 %v1979_v20, %v2587_v46  ;;  %812 = vmatpush1.bf16.msra.mxu1 %v2609_v12  ;;  %v245_v22 = vpop.f32.mrb[9].mxu0  ;;  %853 = vmatpush1.bf16.msra.mxu0 %v2611_v13  ;;  %v322_v20 = vlaneseq }
 0x14d   :  { %v301_v25 = vpack.c.bf16 %v295_v18, %v294_v19  ;;  %v246_v26 = vadd.f32 %v2587_v46, %v245_v22  ;;  %v1980_v27 = vpop.f32.mrb[10].mxu0  ;;  %813 = vmatprep.subr.bf16.mxu1 %v2615_v16  ;;  %854 = vmatprep.subr.bf16.mxu0 %v2617_v17  ;;  %v2701_v18 = vld [vmem:[#allocation9 + $0xe0] ss:$16 sps:$4 sm:$0xff]   ;;  %v2703_v19 = vld [vmem:[#allocation9 + $0xe8] ss:$16 sps:$4 sm:$0xff]  }
 0x14e   :  { %v257_v30 = vadd.f32 %v1980_v27, %v2587_v46  ;;  %v248_v31 = vpop.f32.mrb[11].mxu0  ;;  %v286_v33 = vmax.f32 %v254_v21, 0.0  ;;  %v323_v21 = vshrl.u32 %v322_v20, 7 }
 0x14f   :  { %v249_v32 = vadd.f32 %v2587_v46, %v248_v31  ;;  %1871 = vmatmul.mubr.msk.bf16.gmra.mrb[4].mxu1 %vm422_vm1, %v301_v25  ;;  %1875 = vmatmul.mubr.msk.bf16.gmra.mrb[20].mxu0 %vm422_vm1, %v301_v25  ;;  %v284_v37 = vmax.f32 %v246_v26, 0.0  ;;  %v320_v26 = vld [vmem:[%s3126_s5] sm:$0xf] }
 0x150   :  { %v287_v34 = vmax.f32 %v257_v30, 0.0  ;;  %814 = vmatpush1.bf16.msra.mxu1 %v2624_v23  ;;  %855 = vmatpush1.bf16.msra.mxu0 %v2626_v24  ;;  %v324_v22 = vsub.s32 0, %v323_v21  ;;  %v332_v25 = vsub.s32 2, %v323_v21  ;;  %v328_v27 = vsub.s32 1, %v323_v21 }
 0x151   :  { %v285_v38 = vmax.f32 %v249_v32, 0.0  ;;  %815 = vmatprep.subr.bf16.mxu1 %v2631_v28  ;;  %856 = vmatprep.subr.bf16.mxu0 %v2633_v29  ;;  %v336_v30 = vsub.s32 3, %v323_v21 }
 0x152   :  { %v297_v41 = vmax.f32 %v286_v33, %v287_v34  ;;  %487 = vmatprep.mubr.bf16.mxu1 %v3130_v45  ;;  %560 = vmatprep.mubr.bf16.mxu0 %v3130_v45  ;;  %v325_v33 = vrot.slane %v320_v26, %v324_v22  ;;  %v333_v34 = vrot.slane %v320_v26, %v332_v25 }
 0x153   :  { %v296_v42 = vmax.f32 %v284_v37, %v285_v38  ;;  %v1983_v47 = vpop.f32.mrb[12].mxu0 }
 0x154   :  { %v270_v48 = vadd.f32 %v1983_v47, %v2587_v46  ;;  %816 = vmatpush1.bf16.msra.mxu1 %v2641_v35  ;;  %v261_v49 = vpop.f32.mrb[13].mxu0  ;;  %857 = vmatpush1.bf16.msra.mxu0 %v2643_v36 }
 0x155   :  { %v302_v52 = vpack.c.bf16 %v297_v41, %v296_v42  ;;  %v262_v53 = vadd.f32 %v2587_v46, %v261_v49  ;;  %v1984_v54 = vpop.f32.mrb[14].mxu0  ;;  %817 = vmatprep.subr.bf16.mxu1 %v2647_v39  ;;  %858 = vmatprep.subr.bf16.mxu0 %v2649_v40  ;;  %v329_v41 = vrot.slane %v320_v26, %v328_v27 }
 0x156   :  { %v273_v57 = vadd.f32 %v1984_v54, %v2587_v46  ;;  %v264_v58 = vpop.f32.mrb[15].mxu0  ;;  %v290_v60 = vmax.f32 %v270_v48, 0.0  ;;  %v337_v42 = vrot.slane %v320_v26, %v336_v30 }
 0x157   :  { %v265_v59 = vadd.f32 %v2587_v46, %v264_v58  ;;  %1872 = vmatmul.mubr.msk.bf16.gmra.mrb[8].mxu1 %vm422_vm1, %v302_v52  ;;  %1876 = vmatmul.mubr.msk.bf16.gmra.mrb[24].mxu0 %vm422_vm1, %v302_v52  ;;  %v288_v2 = vmax.f32 %v262_v53, 0.0  ;;  %v2679_v46 = vld [vmem:[#allocation9 + $0xc4] ss:$16 sps:$4 sm:$0xff]  }
 0x158   :  { %v291_v61 = vmax.f32 %v273_v57, 0.0  ;;  %818 = vmatpush1.bf16.msra.mxu1 %v2656_v50  ;;  %859 = vmatpush1.bf16.msra.mxu0 %v2658_v51 }
 0x159   :  { %v289_v3 = vmax.f32 %v265_v59, 0.0  ;;  %819 = vmatprep.subr.bf16.mxu1 %v2663_v55  ;;  %860 = vmatprep.subr.bf16.mxu0 %v2665_v56 }
 0x15a   :  { %v299_v7 = vmax.f32 %v290_v60, %v291_v61  ;;  %497 = vmatprep.mubr.bf16.mxu1 %v3130_v45  ;;  %570 = vmatprep.mubr.bf16.mxu0 %v3130_v45 }
 0x15b   :  { %v298_v8 = vmax.f32 %v288_v2, %v289_v3 }
 0x15c   :  { %820 = vmatpush1.bf16.msra.mxu1 %v2673_v62  ;;  %861 = vmatpush1.bf16.msra.mxu0 %v2675_v63 }
 0x15d   :  { %v303_v11 = vpack.c.bf16 %v299_v7, %v298_v8  ;;  %821 = vmatprep.subr.bf16.mxu1 %v2679_v46  ;;  %862 = vmatprep.subr.bf16.mxu0 %v2681_v4 }
 0x15f   :  { %1873 = vmatmul.mubr.msk.bf16.gmra.mrb[12].mxu1 %vm422_vm1, %v303_v11  ;;  %1877 = vmatmul.mubr.msk.bf16.gmra.mrb[28].mxu0 %vm422_vm1, %v303_v11 }
 0x160   :  { %822 = vmatpush1.bf16.msra.mxu1 %v2687_v9  ;;  %863 = vmatpush1.bf16.msra.mxu0 %v2689_v10 }
 0x161   :  { %823 = vmatprep.subr.bf16.mxu1 %v2693_v14  ;;  %864 = vmatprep.subr.bf16.mxu0 %v2695_v15 }
 0x162   :  { %841 = vmatprep.mubr.bf16.mxu1 %v3130_v45  ;;  %882 = vmatprep.mubr.bf16.mxu0 %v3130_v45 }
 0x164   :  { %824 = vmatpush1.bf16.msra.mxu1 %v2701_v18  ;;  %865 = vmatpush1.bf16.msra.mxu0 %v2703_v19 }
 0x165   :  { %925 = vmatprep.subr.bf16.mxu1 %v2576_v43  ;;  %966 = vmatprep.subr.bf16.mxu0 %v2578_v44 }
 0x167   :  { %842 = vmatmul.mubr.bf16.vlgmr.msra.gmra.mrb[16].mxu1 %v3130_v45  ;;  %883 = vmatmul.mubr.bf16.vlgmr.msra.gmra.mrb[32].mxu0 %v3130_v45 }
 0x168   :  { %926 = vmatpush1.bf16.msra.mxu1 %v2594_v0  ;;  %967 = vmatpush1.bf16.msra.mxu0 %v2596_v1 }
 0x169   :  { %927 = vmatprep.subr.bf16.mxu1 %v2599_v5  ;;  %968 = vmatprep.subr.bf16.mxu0 %v2601_v6 }
 0x16a   :  { %957 = vmatprep.mubr.bf16.mxu1 %v3130_v45  ;;  %998 = vmatprep.mubr.bf16.mxu0 %v3130_v45 }
 0x16c   :  { %928 = vmatpush1.bf16.msra.mxu1 %v2609_v12  ;;  %969 = vmatpush1.bf16.msra.mxu0 %v2611_v13 }
 0x16d   :  { %929 = vmatprep.subr.bf16.mxu1 %v2615_v16  ;;  %970 = vmatprep.subr.bf16.mxu0 %v2617_v17 }
 0x170   :  { %930 = vmatpush1.bf16.msra.mxu1 %v2624_v23  ;;  %971 = vmatpush1.bf16.msra.mxu0 %v2626_v24 }
 0x171   :  { %931 = vmatprep.subr.bf16.mxu1 %v2631_v28  ;;  %972 = vmatprep.subr.bf16.mxu0 %v2633_v29 }
 0x174   :  { %932 = vmatpush1.bf16.msra.mxu1 %v2641_v35  ;;  %973 = vmatpush1.bf16.msra.mxu0 %v2643_v36 }
 0x175   :  { %933 = vmatprep.subr.bf16.mxu1 %v2647_v39  ;;  %974 = vmatprep.subr.bf16.mxu0 %v2649_v40 }
 0x178   :  { %934 = vmatpush1.bf16.msra.mxu1 %v2656_v50  ;;  %975 = vmatpush1.bf16.msra.mxu0 %v2658_v51 }
 0x179   :  { %935 = vmatprep.subr.bf16.mxu1 %v2663_v55  ;;  %976 = vmatprep.subr.bf16.mxu0 %v2665_v56 }
 0x17c   :  { %936 = vmatpush1.bf16.msra.mxu1 %v2673_v62  ;;  %977 = vmatpush1.bf16.msra.mxu0 %v2675_v63 }
 0x17d   :  { %937 = vmatprep.subr.bf16.mxu1 %v2679_v46  ;;  %978 = vmatprep.subr.bf16.mxu0 %v2681_v4 }
 0x180   :  { %938 = vmatpush1.bf16.msra.mxu1 %v2687_v9  ;;  %979 = vmatpush1.bf16.msra.mxu0 %v2689_v10 }
 0x181   :  { %939 = vmatprep.subr.bf16.mxu1 %v2693_v14  ;;  %980 = vmatprep.subr.bf16.mxu0 %v2695_v15 }
 0x184   :  { %940 = vmatpush1.bf16.msra.mxu1 %v2701_v18  ;;  %981 = vmatpush1.bf16.msra.mxu0 %v2703_v19 }
 0x185   :  { %1041 = vmatprep.subr.bf16.mxu1 %v2576_v43  ;;  %1082 = vmatprep.subr.bf16.mxu0 %v2578_v44 }
 0x21a   :  { %v2752_v31 = vpop.f32.mrb[0].mxu1  ;;  %v2754_v32 = vpop.f32.mrb[16].mxu0 }
 0x21b   :  { %v471_v37 = vpop.f32.mrb[1].mxu1  ;;  %v544_v38 = vpop.f32.mrb[17].mxu0 }
 0x21c   :  { %v473_v47 = vpop.f32.mrb[2].mxu1  ;;  %v546_v48 = vpop.f32.mrb[18].mxu0 }
 0x21d   :  { %v2756_v49 = vadd.f32 %v473_v47, %v325_v33  ;;  %v2758_v52 = vadd.f32 %v546_v48, %v333_v34  ;;  %v475_v53 = vpop.f32.mrb[3].mxu1  ;;  %v548_v54 = vpop.f32.mrb[19].mxu0 }
 0x21e   :  { %v2760_v57 = vadd.f32 %v475_v53, %v329_v41  ;;  %v2762_v58 = vadd.f32 %v548_v54, %v337_v42 }
 0x222   :  { %v479_v59 = vpop.f32.mrb[4].mxu1  ;;  %v552_v60 = vpop.f32.mrb[20].mxu0 }
 0x223   :  { %v2764_v61 = vadd.f32 %v479_v59, %v325_v33  ;;  %v2766_v2 = vadd.f32 %v552_v60, %v333_v34  ;;  %v481_v3 = vpop.f32.mrb[5].mxu1  ;;  %v554_v7 = vpop.f32.mrb[21].mxu0 }
 0x224   :  { %v2768_v8 = vadd.f32 %v481_v3, %v329_v41  ;;  %v2770_v11 = vadd.f32 %v554_v7, %v337_v42  ;;  %v483_v20 = vpop.f32.mrb[6].mxu1  ;;  %v556_v21 = vpop.f32.mrb[22].mxu0 }
 0x225   :  { %v2772_v22 = vadd.f32 %v483_v20, %v325_v33  ;;  %v2774_v25 = vadd.f32 %v556_v21, %v333_v34  ;;  %v485_v26 = vpop.f32.mrb[7].mxu1  ;;  %v558_v27 = vpop.f32.mrb[23].mxu0 }
 0x226   :  { %3132 = vst [vmem:[#allocation17_spill] sm:$0xff] %v2768_v8  ;;  %3133 = vst [vmem:[#allocation18_spill] sm:$0xff] %v2770_v11  ;;  %v2776_v30 = vadd.f32 %v485_v26, %v329_v41  ;;  %v2778_v47 = vadd.f32 %v558_v27, %v337_v42 }
 0x227   :  { %3134 = vst [vmem:[#allocation19_spill] sm:$0xff] %v2772_v22  ;;  %3135 = vst [vmem:[#allocation20_spill] sm:$0xff] %v2774_v25 }
 0x228   :  { %3136 = vst [vmem:[#allocation21_spill] sm:$0xff] %v2776_v30  ;;  %3137 = vst [vmem:[#allocation22_spill] sm:$0xff] %v2778_v47 }
 0x22a   :  { %v489_v48 = vpop.f32.mrb[8].mxu1  ;;  %v562_v53 = vpop.f32.mrb[24].mxu0 }
 0x22b   :  { %v2780_v54 = vadd.f32 %v489_v48, %v325_v33  ;;  %v2782_v59 = vadd.f32 %v562_v53, %v333_v34  ;;  %v491_v60 = vpop.f32.mrb[9].mxu1  ;;  %v564_v3 = vpop.f32.mrb[25].mxu0 }
 0x22c   :  { %v2784_v7 = vadd.f32 %v491_v60, %v329_v41  ;;  %v2786_v20 = vadd.f32 %v564_v3, %v337_v42  ;;  %v493_v21 = vpop.f32.mrb[10].mxu1  ;;  %v566_v45 = vpop.f32.mrb[26].mxu0 }
 0x22d   :  { %3138 = vst [vmem:[#allocation23_spill] sm:$0xff] %v2780_v54  ;;  %3139 = vst [vmem:[#allocation24_spill] sm:$0xff] %v2782_v59  ;;  %v2788_v25 = vadd.f32 %v493_v21, %v325_v33  ;;  %v2790_v26 = vadd.f32 %v566_v45, %v333_v34  ;;  %v495_v27 = vpop.f32.mrb[11].mxu1  ;;  %v568_v47 = vpop.f32.mrb[27].mxu0 }
 0x22e   :  { %3140 = vst [vmem:[#allocation25_spill] sm:$0xff] %v2784_v7  ;;  %3141 = vst [vmem:[#allocation26_spill] sm:$0xff] %v2786_v20  ;;  %v2792_v30 = vadd.f32 %v495_v27, %v329_v41  ;;  %v2794_v48 = vadd.f32 %v568_v47, %v337_v42 }
 0x22f   :  { %3142 = vst [vmem:[#allocation27_spill] sm:$0xff] %v2788_v25  ;;  %3143 = vst [vmem:[#allocation28_spill] sm:$0xff] %v2790_v26 }
 0x230   :  { %3144 = vst [vmem:[#allocation29_spill] sm:$0xff] %v2792_v30  ;;  %3145 = vst [vmem:[#allocation30_spill] sm:$0xff] %v2794_v48 }
 0x232   :  { %v499_v53 = vpop.f32.mrb[12].mxu1  ;;  %v572_v59 = vpop.f32.mrb[28].mxu0 }
 0x233   :  { %v2796_v54 = vadd.f32 %v499_v53, %v325_v33  ;;  %v2798_v60 = vadd.f32 %v572_v59, %v333_v34  ;;  %v501_v3 = vpop.f32.mrb[13].mxu1  ;;  %v574_v20 = vpop.f32.mrb[29].mxu0  ;;  %v470_v59 = vadd.f32 %v2752_v31, %v325_v33 }
 0x234   :  { %v2800_v7 = vadd.f32 %v501_v3, %v329_v41  ;;  %v2802_v21 = vadd.f32 %v574_v20, %v337_v42  ;;  %v503_v45 = vpop.f32.mrb[14].mxu1  ;;  %v576_v26 = vpop.f32.mrb[30].mxu0  ;;  %v472_v3 = vadd.f32 %v471_v37, %v329_v41 }
 0x235   :  { %3146 = vst [vmem:[#allocation31_spill] sm:$0xff] %v2796_v54  ;;  %3147 = vst [vmem:[#allocation32_spill] sm:$0xff] %v2798_v60  ;;  %v2804_v25 = vadd.f32 %v503_v45, %v325_v33  ;;  %v2806_v27 = vadd.f32 %v576_v26, %v333_v34  ;;  %v505_v47 = vpop.f32.mrb[15].mxu1  ;;  %v578_v48 = vpop.f32.mrb[31].mxu0  ;;  %v543_v60 = vadd.f32 %v2754_v32, %v333_v34 }
 0x236   :  { %3148 = vst [vmem:[#allocation33_spill] sm:$0xff] %v2800_v7  ;;  %3149 = vst [vmem:[#allocation34_spill] sm:$0xff] %v2802_v21  ;;  %v2808_v30 = vadd.f32 %v505_v47, %v329_v41  ;;  %v2810_v53 = vadd.f32 %v578_v48, %v337_v42  ;;  %v545_v7 = vadd.f32 %v544_v38, %v337_v42 }
 0x237   :  { %3150 = vst [vmem:[#allocation35_spill] sm:$0xff] %v2804_v25  ;;  %3151 = vst [vmem:[#allocation36_spill] sm:$0xff] %v2806_v27 }
 0x238   :  { %3152 = vst [vmem:[#allocation37_spill] sm:$0xff] %v2808_v30  ;;  %3153 = vst [vmem:[#allocation38_spill] sm:$0xff] %v2810_v53 }
 0x23a   :  { %v843_v20 = vpop.f32.mrb[16].mxu1  ;;  %v884_v21 = vpop.f32.mrb[32].mxu0 }
 0x23b   :  { %v891_v54 = vadd.f32 %v843_v20, %v470_v59  ;;  %v893_v22 = vadd.f32 %v884_v21, %v543_v60  ;;  %v845_v45 = vpop.f32.mrb[17].mxu1  ;;  %v886_v25 = vpop.f32.mrb[33].mxu0 }
 0x23c   :  { %v892_v26 = vadd.f32 %v845_v45, %v472_v3  ;;  %v894_v27 = vadd.f32 %v886_v25, %v545_v7  ;;  %v847_v11 = vpop.f32.mrb[18].mxu1  ;;  %v888_v8 = vpop.f32.mrb[34].mxu0 }
 0x23d   :  { %v1910_v47 = vmul.f32 -1.442695, %v891_v54  ;;  %v848_v30 = vpop.f32.mrb[19].mxu1  ;;  %v889_v48 = vpop.f32.mrb[35].mxu0 }
 0x23e   :  { %v1911_v53 = vmul.f32 -1.442695, %v892_v26  ;;  %v1912_v31 = vmul.f32 -1.442695, %v894_v27 }
 0x23f   :  { %2135 = vpow2.f32 %v1910_v47 }
 0x240   :  { %2137 = vpow2.f32 %v1911_v53 }
 0x241   :  { %2139 = vpow2.f32 %v1912_v31 }
 0x242   :  { %2141 = vtanh.f32 %v893_v22  ;;  %v3154_v22 = vmov 0  }
 0x249   :  { %v2136_v32 = vpop.eup %2135 }
 0x24a   :  { %v2138_v33 = vpop.eup %2137  ;;  %v898_v34 = vadd.f32 1.0, %v2136_v32 }
 0x24b   :  { %v904_v37 = vadd.f32 1.0, %v2138_v33  ;;  %v2140_v38 = vpop.eup %2139 }
 0x24c   :  { %2143 = vrcp.f32 %v898_v34  ;;  %v2142_v41 = vpop.eup %2141  ;;  %v911_v25 = vadd.f32 1.0, %v2140_v38 }
 0x24d   :  { %2145 = vrcp.f32 %v904_v37 }
 0x24e   :  { %2147 = vrcp.f32 %v911_v25 }
 0x256   :  { %v2144_v42 = vpop.eup %2143 }
 0x257   :  { %v2146_v11 = vpop.eup %2145  ;;  %v915_v8 = vmul.f32 %v2144_v42, %v2142_v41 }
 0x258   :  { %v914_v30 = vmul.f32 0.0, %v2146_v11  ;;  %v2148_v7 = vpop.eup %2147 }
 0x25a   :  { %v2814_v54 = vadd.f32 %v915_v8, %v914_v30 }
 0x25c   :  { %2149 = vtanh.f32 %v2814_v54 }
 0x266   :  { %v2150_v60 = vpop.eup %2149 }
 0x267   :  { %v918_v21 = vmul.f32 %v2150_v60, %v2148_v7 }
 0x269   :  { %v924_v27 = vpack.c.bf16 %v918_v21, %v918_v21 }
 0x26b   :  { %958 = vmatmul.mubr.bf16.vlgmr.msra.gmra.mrb[20].mxu1 %v924_v27  ;;  %999 = vmatmul.mubr.bf16.vlgmr.msra.gmra.mrb[36].mxu0 %v924_v27 }
 0x26c   :  { %1042 = vmatpush1.bf16.msra.mxu1 %v2594_v0  ;;  %1083 = vmatpush1.bf16.msra.mxu0 %v2596_v1 }
 0x26d   :  { %1043 = vmatprep.subr.bf16.mxu1 %v2599_v5  ;;  %1084 = vmatprep.subr.bf16.mxu0 %v2601_v6 }
 0x26e   :  { %1073 = vmatprep.mubr.bf16.mxu1 %v3154_v22  ;;  %1114 = vmatprep.mubr.bf16.mxu0 %v3154_v22 }
 0x270   :  { %1044 = vmatpush1.bf16.msra.mxu1 %v2609_v12  ;;  %1085 = vmatpush1.bf16.msra.mxu0 %v2611_v13 }
 0x271   :  { %1045 = vmatprep.subr.bf16.mxu1 %v2615_v16  ;;  %1086 = vmatprep.subr.bf16.mxu0 %v2617_v17 }
 0x274   :  { %1046 = vmatpush1.bf16.msra.mxu1 %v2624_v23  ;;  %1087 = vmatpush1.bf16.msra.mxu0 %v2626_v24 }
 0x275   :  { %1047 = vmatprep.subr.bf16.mxu1 %v2631_v28  ;;  %1088 = vmatprep.subr.bf16.mxu0 %v2633_v29 }
 0x278   :  { %1048 = vmatpush1.bf16.msra.mxu1 %v2641_v35  ;;  %1089 = vmatpush1.bf16.msra.mxu0 %v2643_v36 }
 0x279   :  { %1049 = vmatprep.subr.bf16.mxu1 %v2647_v39  ;;  %1090 = vmatprep.subr.bf16.mxu0 %v2649_v40 }
 0x27c   :  { %1050 = vmatpush1.bf16.msra.mxu1 %v2656_v50  ;;  %1091 = vmatpush1.bf16.msra.mxu0 %v2658_v51 }
 0x27d   :  { %1051 = vmatprep.subr.bf16.mxu1 %v2663_v55  ;;  %1092 = vmatprep.subr.bf16.mxu0 %v2665_v56 }
 0x280   :  { %1052 = vmatpush1.bf16.msra.mxu1 %v2673_v62  ;;  %1093 = vmatpush1.bf16.msra.mxu0 %v2675_v63 }
 0x281   :  { %1053 = vmatprep.subr.bf16.mxu1 %v2679_v46  ;;  %1094 = vmatprep.subr.bf16.mxu0 %v2681_v4 }
 0x284   :  { %1054 = vmatpush1.bf16.msra.mxu1 %v2687_v9  ;;  %1095 = vmatpush1.bf16.msra.mxu0 %v2689_v10 }
 0x285   :  { %1055 = vmatprep.subr.bf16.mxu1 %v2693_v14  ;;  %1096 = vmatprep.subr.bf16.mxu0 %v2695_v15 }
 0x288   :  { %1056 = vmatpush1.bf16.msra.mxu1 %v2701_v18  ;;  %1097 = vmatpush1.bf16.msra.mxu0 %v2703_v19 }
 0x289   :  { %1157 = vmatprep.subr.bf16.mxu1 %v2576_v43  ;;  %1198 = vmatprep.subr.bf16.mxu0 %v2578_v44 }
 0x33e   :  { %v959_v53 = vpop.f32.mrb[20].mxu1  ;;  %v1000_v59 = vpop.f32.mrb[36].mxu0 }
 0x33f   :  { %v1007_v3 = vadd.f32 %v959_v53, %v2756_v49  ;;  %v1009_v20 = vadd.f32 %v1000_v59, %v2758_v52  ;;  %v961_v45 = vpop.f32.mrb[21].mxu1  ;;  %v1002_v26 = vpop.f32.mrb[37].mxu0 }
 0x340   :  { %v1008_v47 = vadd.f32 %v961_v45, %v2760_v57  ;;  %v1010_v48 = vadd.f32 %v1002_v26, %v2762_v58  ;;  %v963_v31 = vpop.f32.mrb[22].mxu1  ;;  %v1004_v32 = vpop.f32.mrb[38].mxu0 }
 0x341   :  { %v1913_v33 = vmul.f32 -1.442695, %v1007_v3  ;;  %v964_v34 = vpop.f32.mrb[23].mxu1  ;;  %v1005_v37 = vpop.f32.mrb[39].mxu0  ;;  %v3155_v31 = vld [vmem:[#allocation17_spill] sm:$0xff] }
 0x342   :  { %v1914_v38 = vmul.f32 -1.442695, %v1008_v47  ;;  %v1915_v41 = vmul.f32 -1.442695, %v1010_v48 }
 0x343   :  { %2151 = vpow2.f32 %v1913_v33  ;;  %v3156_v33 = vld [vmem:[#allocation18_spill] sm:$0xff] }
 0x344   :  { %2153 = vpow2.f32 %v1914_v38 }
 0x345   :  { %2155 = vpow2.f32 %v1915_v41 }
 0x346   :  { %2157 = vtanh.f32 %v1009_v20 }
 0x34d   :  { %v2152_v42 = vpop.eup %2151 }
 0x34e   :  { %v2154_v11 = vpop.eup %2153  ;;  %v1014_v49 = vadd.f32 1.0, %v2152_v42 }
 0x34f   :  { %v1020_v52 = vadd.f32 1.0, %v2154_v11  ;;  %v2156_v57 = vpop.eup %2155 }
 0x350   :  { %2159 = vrcp.f32 %v1014_v49  ;;  %v2158_v8 = vpop.eup %2157  ;;  %v1027_v7 = vadd.f32 1.0, %v2156_v57 }
 0x351   :  { %2161 = vrcp.f32 %v1020_v52 }
 0x352   :  { %2163 = vrcp.f32 %v1027_v7 }
 0x35a   :  { %v2160_v58 = vpop.eup %2159 }
 0x35b   :  { %v2162_v25 = vpop.eup %2161  ;;  %v1031_v30 = vmul.f32 %v2160_v58, %v2158_v8 }
 0x35c   :  { %v1030_v60 = vmul.f32 %v2162_v25, %v2814_v54  ;;  %v2164_v27 = vpop.eup %2163 }
 0x35e   :  { %v2856_v21 = vadd.f32 %v1031_v30, %v1030_v60 }
 0x360   :  { %2165 = vtanh.f32 %v2856_v21 }
 0x36a   :  { %v2166_v53 = vpop.eup %2165 }
 0x36b   :  { %v1034_v59 = vmul.f32 %v2166_v53, %v2164_v27 }
 0x36d   :  { %v1040_v3 = vpack.c.bf16 %v1034_v59, %v1034_v59 }
 0x36f   :  { %1074 = vmatmul.mubr.bf16.vlgmr.msra.gmra.mrb[24].mxu1 %v1040_v3  ;;  %1115 = vmatmul.mubr.bf16.vlgmr.msra.gmra.mrb[40].mxu0 %v1040_v3 }
 0x370   :  { %1158 = vmatpush1.bf16.msra.mxu1 %v2594_v0  ;;  %1199 = vmatpush1.bf16.msra.mxu0 %v2596_v1 }
 0x371   :  { %1159 = vmatprep.subr.bf16.mxu1 %v2599_v5  ;;  %1200 = vmatprep.subr.bf16.mxu0 %v2601_v6 }
 0x372   :  { %1189 = vmatprep.mubr.bf16.mxu1 %v3154_v22  ;;  %1230 = vmatprep.mubr.bf16.mxu0 %v3154_v22 }
 0x374   :  { %1160 = vmatpush1.bf16.msra.mxu1 %v2609_v12  ;;  %1201 = vmatpush1.bf16.msra.mxu0 %v2611_v13 }
 0x375   :  { %1161 = vmatprep.subr.bf16.mxu1 %v2615_v16  ;;  %1202 = vmatprep.subr.bf16.mxu0 %v2617_v17 }
 0x378   :  { %1162 = vmatpush1.bf16.msra.mxu1 %v2624_v23  ;;  %1203 = vmatpush1.bf16.msra.mxu0 %v2626_v24 }
 0x379   :  { %1163 = vmatprep.subr.bf16.mxu1 %v2631_v28  ;;  %1204 = vmatprep.subr.bf16.mxu0 %v2633_v29 }
 0x37c   :  { %1164 = vmatpush1.bf16.msra.mxu1 %v2641_v35  ;;  %1205 = vmatpush1.bf16.msra.mxu0 %v2643_v36 }
 0x37d   :  { %1165 = vmatprep.subr.bf16.mxu1 %v2647_v39  ;;  %1206 = vmatprep.subr.bf16.mxu0 %v2649_v40 }
 0x380   :  { %1166 = vmatpush1.bf16.msra.mxu1 %v2656_v50  ;;  %1207 = vmatpush1.bf16.msra.mxu0 %v2658_v51 }
 0x381   :  { %1167 = vmatprep.subr.bf16.mxu1 %v2663_v55  ;;  %1208 = vmatprep.subr.bf16.mxu0 %v2665_v56 }
 0x384   :  { %1168 = vmatpush1.bf16.msra.mxu1 %v2673_v62  ;;  %1209 = vmatpush1.bf16.msra.mxu0 %v2675_v63 }
 0x385   :  { %1169 = vmatprep.subr.bf16.mxu1 %v2679_v46  ;;  %1210 = vmatprep.subr.bf16.mxu0 %v2681_v4 }
 0x388   :  { %1170 = vmatpush1.bf16.msra.mxu1 %v2687_v9  ;;  %1211 = vmatpush1.bf16.msra.mxu0 %v2689_v10 }
 0x389   :  { %1171 = vmatprep.subr.bf16.mxu1 %v2693_v14  ;;  %1212 = vmatprep.subr.bf16.mxu0 %v2695_v15 }
 0x38c   :  { %1172 = vmatpush1.bf16.msra.mxu1 %v2701_v18  ;;  %1213 = vmatpush1.bf16.msra.mxu0 %v2703_v19 }
 0x38d   :  { %1273 = vmatprep.subr.bf16.mxu1 %v2576_v43  ;;  %1314 = vmatprep.subr.bf16.mxu0 %v2578_v44 }
 0x442   :  { %v1075_v54 = vpop.f32.mrb[24].mxu1  ;;  %v1116_v20 = vpop.f32.mrb[40].mxu0 }
 0x443   :  { %v1123_v45 = vadd.f32 %v1075_v54, %v2764_v61  ;;  %v1125_v26 = vadd.f32 %v1116_v20, %v2766_v2  ;;  %v1077_v47 = vpop.f32.mrb[25].mxu1  ;;  %v1118_v48 = vpop.f32.mrb[41].mxu0 }
 0x444   :  { %v1124_v32 = vadd.f32 %v1077_v47, %v3155_v31  ;;  %v1126_v34 = vadd.f32 %v1118_v48, %v3156_v33  ;;  %v1079_v37 = vpop.f32.mrb[26].mxu1  ;;  %v1120_v38 = vpop.f32.mrb[42].mxu0  ;;  %v3157_v47 = vld [vmem:[#allocation19_spill] sm:$0xff]  ;;  %v3158_v31 = vld [vmem:[#allocation20_spill] sm:$0xff] }
 0x445   :  { %v1916_v41 = vmul.f32 -1.442695, %v1123_v45  ;;  %v1080_v42 = vpop.f32.mrb[27].mxu1  ;;  %v1121_v11 = vpop.f32.mrb[43].mxu0  ;;  %v3159_v37 = vld [vmem:[#allocation21_spill] sm:$0xff] }
 0x446   :  { %v1917_v49 = vmul.f32 -1.442695, %v1124_v32  ;;  %v1918_v52 = vmul.f32 -1.442695, %v1126_v34 }
 0x447   :  { %2167 = vpow2.f32 %v1916_v41  ;;  %v3160_v41 = vld [vmem:[#allocation22_spill] sm:$0xff] }
 0x448   :  { %2169 = vpow2.f32 %v1917_v49 }
 0x449   :  { %2171 = vpow2.f32 %v1918_v52 }
 0x44a   :  { %2173 = vtanh.f32 %v1125_v26 }
 0x451   :  { %v2168_v57 = vpop.eup %2167 }
 0x452   :  { %v2170_v8 = vpop.eup %2169  ;;  %v1130_v61 = vadd.f32 1.0, %v2168_v57 }
 0x453   :  { %v1136_v2 = vadd.f32 1.0, %v2170_v8  ;;  %v2172_v58 = vpop.eup %2171 }
 0x454   :  { %2175 = vrcp.f32 %v1130_v61  ;;  %v2174_v25 = vpop.eup %2173  ;;  %v1143_v27 = vadd.f32 1.0, %v2172_v58 }
 0x455   :  { %2177 = vrcp.f32 %v1136_v2 }
 0x456   :  { %2179 = vrcp.f32 %v1143_v27 }
 0x45e   :  { %v2176_v30 = vpop.eup %2175 }
 0x45f   :  { %v2178_v7 = vpop.eup %2177  ;;  %v1147_v60 = vmul.f32 %v2176_v30, %v2174_v25 }
 0x460   :  { %v1146_v53 = vmul.f32 %v2178_v7, %v2856_v21  ;;  %v2180_v3 = vpop.eup %2179 }
 0x462   :  { %v2898_v59 = vadd.f32 %v1147_v60, %v1146_v53 }
 0x464   :  { %2181 = vtanh.f32 %v2898_v59 }
 0x46e   :  { %v2182_v54 = vpop.eup %2181 }
 0x46f   :  { %v1150_v20 = vmul.f32 %v2182_v54, %v2180_v3 }
 0x471   :  { %v1156_v45 = vpack.c.bf16 %v1150_v20, %v1150_v20 }
 0x473   :  { %1190 = vmatmul.mubr.bf16.vlgmr.msra.gmra.mrb[28].mxu1 %v1156_v45  ;;  %1231 = vmatmul.mubr.bf16.vlgmr.msra.gmra.mrb[44].mxu0 %v1156_v45 }
 0x474   :  { %1274 = vmatpush1.bf16.msra.mxu1 %v2594_v0  ;;  %1315 = vmatpush1.bf16.msra.mxu0 %v2596_v1 }
 0x475   :  { %1275 = vmatprep.subr.bf16.mxu1 %v2599_v5  ;;  %1316 = vmatprep.subr.bf16.mxu0 %v2601_v6 }
 0x476   :  { %1305 = vmatprep.mubr.bf16.mxu1 %v3154_v22  ;;  %1346 = vmatprep.mubr.bf16.mxu0 %v3154_v22 }
 0x478   :  { %1276 = vmatpush1.bf16.msra.mxu1 %v2609_v12  ;;  %1317 = vmatpush1.bf16.msra.mxu0 %v2611_v13 }
 0x479   :  { %1277 = vmatprep.subr.bf16.mxu1 %v2615_v16  ;;  %1318 = vmatprep.subr.bf16.mxu0 %v2617_v17 }
 0x47c   :  { %1278 = vmatpush1.bf16.msra.mxu1 %v2624_v23  ;;  %1319 = vmatpush1.bf16.msra.mxu0 %v2626_v24 }
 0x47d   :  { %1279 = vmatprep.subr.bf16.mxu1 %v2631_v28  ;;  %1320 = vmatprep.subr.bf16.mxu0 %v2633_v29 }
 0x480   :  { %1280 = vmatpush1.bf16.msra.mxu1 %v2641_v35  ;;  %1321 = vmatpush1.bf16.msra.mxu0 %v2643_v36 }
 0x481   :  { %1281 = vmatprep.subr.bf16.mxu1 %v2647_v39  ;;  %1322 = vmatprep.subr.bf16.mxu0 %v2649_v40 }
 0x484   :  { %1282 = vmatpush1.bf16.msra.mxu1 %v2656_v50  ;;  %1323 = vmatpush1.bf16.msra.mxu0 %v2658_v51 }
 0x485   :  { %1283 = vmatprep.subr.bf16.mxu1 %v2663_v55  ;;  %1324 = vmatprep.subr.bf16.mxu0 %v2665_v56 }
 0x488   :  { %1284 = vmatpush1.bf16.msra.mxu1 %v2673_v62  ;;  %1325 = vmatpush1.bf16.msra.mxu0 %v2675_v63 }
 0x489   :  { %1285 = vmatprep.subr.bf16.mxu1 %v2679_v46  ;;  %1326 = vmatprep.subr.bf16.mxu0 %v2681_v4 }
 0x48c   :  { %1286 = vmatpush1.bf16.msra.mxu1 %v2687_v9  ;;  %1327 = vmatpush1.bf16.msra.mxu0 %v2689_v10 }
 0x48d   :  { %1287 = vmatprep.subr.bf16.mxu1 %v2693_v14  ;;  %1328 = vmatprep.subr.bf16.mxu0 %v2695_v15 }
 0x490   :  { %1288 = vmatpush1.bf16.msra.mxu1 %v2701_v18  ;;  %1329 = vmatpush1.bf16.msra.mxu0 %v2703_v19 }
 0x491   :  { %1389 = vmatprep.subr.bf16.mxu1 %v2576_v43  ;;  %1430 = vmatprep.subr.bf16.mxu0 %v2578_v44 }
 0x546   :  { %v1191_v21 = vpop.f32.mrb[28].mxu1  ;;  %v1232_v26 = vpop.f32.mrb[44].mxu0 }
 0x547   :  { %v1239_v48 = vadd.f32 %v1191_v21, %v3157_v47  ;;  %v1241_v32 = vadd.f32 %v1232_v26, %v3158_v31  ;;  %v1193_v33 = vpop.f32.mrb[29].mxu1  ;;  %v1234_v34 = vpop.f32.mrb[45].mxu0 }
 0x548   :  { %v1240_v38 = vadd.f32 %v1193_v33, %v3159_v37  ;;  %v1242_v42 = vadd.f32 %v1234_v34, %v3160_v41  ;;  %v1195_v11 = vpop.f32.mrb[30].mxu1  ;;  %v1236_v49 = vpop.f32.mrb[46].mxu0 }
 0x549   :  { %v1919_v52 = vmul.f32 -1.442695, %v1239_v48  ;;  %v1196_v57 = vpop.f32.mrb[31].mxu1  ;;  %v1237_v8 = vpop.f32.mrb[47].mxu0 }
 0x54a   :  { %v1920_v43 = vmul.f32 -1.442695, %v1240_v38  ;;  %v1921_v44 = vmul.f32 -1.442695, %v1242_v42 }
 0x54b   :  { %2183 = vpow2.f32 %v1919_v52 }
 0x54c   :  { %2185 = vpow2.f32 %v1920_v43 }
 0x54d   :  { %2187 = vpow2.f32 %v1921_v44 }
 0x54e   :  { %2189 = vtanh.f32 %v1241_v32 }
 0x555   :  { %v2184_v61 = vpop.eup %2183 }
 0x556   :  { %v2186_v2 = vpop.eup %2185  ;;  %v1246_v58 = vadd.f32 1.0, %v2184_v61  ;;  %v2989_v61 = vld [vmem:[#allocation9] ss:$16 sps:$4 sm:$0xff]  }
 0x557   :  { %v1252_v25 = vadd.f32 1.0, %v2186_v2  ;;  %v2188_v30 = vpop.eup %2187  ;;  %v2992_v2 = vld [vmem:[#allocation9 + $0x8] ss:$16 sps:$4 sm:$0xff]  }
 0x558   :  { %2191 = vrcp.f32 %v1246_v58  ;;  %v2190_v7 = vpop.eup %2189  ;;  %v1259_v3 = vadd.f32 1.0, %v2188_v30  ;;  %v2995_v58 = vld [vmem:[#allocation9 + $0x24] ss:$16 sps:$4 sm:$0xff]   ;;  %v3003_v30 = vld [vmem:[#allocation9 + $0x20] ss:$16 sps:$4 sm:$0xff]  }
 0x559   :  { %2193 = vrcp.f32 %v1252_v25  ;;  %v2998_v25 = vld [vmem:[#allocation9 + $0x2c] ss:$16 sps:$4 sm:$0xff]  }
 0x55a   :  { %2195 = vrcp.f32 %v1259_v3  ;;  %v3018_v3 = vld [vmem:[#allocation9 + $0x48] ss:$16 sps:$4 sm:$0xff]  }
 0x562   :  { %v2192_v60 = vpop.eup %2191 }
 0x563   :  { %v2194_v27 = vpop.eup %2193  ;;  %v1263_v53 = vmul.f32 %v2192_v60, %v2190_v7  ;;  %v3006_v7 = vld [vmem:[#allocation9 + $0x28] ss:$16 sps:$4 sm:$0xff]   ;;  %v3009_v60 = vld [vmem:[#allocation9 + $0x44] ss:$16 sps:$4 sm:$0xff]  }
 0x564   :  { %v1262_v54 = vmul.f32 %v2194_v27, %v2898_v59  ;;  %v2196_v45 = vpop.eup %2195  ;;  %v3012_v27 = vld [vmem:[#allocation9 + $0x4c] ss:$16 sps:$4 sm:$0xff]  }
 0x566   :  { %v2940_v20 = vadd.f32 %v1263_v53, %v1262_v54  ;;  %v3015_v53 = vld [vmem:[#allocation9 + $0x40] ss:$16 sps:$4 sm:$0xff]   ;;  %v3021_v54 = vld [vmem:[#allocation9 + $0x64] ss:$16 sps:$4 sm:$0xff]  }
 0x568   :  { %2197 = vtanh.f32 %v2940_v20 }
 0x572   :  { %v2198_v21 = vpop.eup %2197 }
 0x573   :  { %v1266_v26 = vmul.f32 %v2198_v21, %v2196_v45  ;;  %v3027_v45 = vld [vmem:[#allocation9 + $0x60] ss:$16 sps:$4 sm:$0xff]   ;;  %v3030_v21 = vld [vmem:[#allocation9 + $0x68] ss:$16 sps:$4 sm:$0xff]  }
 0x575   :  { %v1272_v47 = vpack.c.bf16 %v1266_v26, %v1266_v26  ;;  %v3033_v26 = vld [vmem:[#allocation9 + $0x84] ss:$16 sps:$4 sm:$0xff]  }
 0x577   :  { %1306 = vmatmul.mubr.bf16.vlgmr.msra.gmra.mrb[32].mxu1 %v1272_v47  ;;  %1347 = vmatmul.mubr.bf16.vlgmr.msra.gmra.mrb[48].mxu0 %v1272_v47  ;;  %v3036_v47 = vld [vmem:[#allocation9 + $0x8c] ss:$16 sps:$4 sm:$0xff]  }
 0x578   :  { %1390 = vmatpush1.bf16.msra.mxu1 %v2594_v0  ;;  %1431 = vmatpush1.bf16.msra.mxu0 %v2596_v1  ;;  %v2975_v0 = vld [vmem:[#allocation9 + $0x4] ss:$16 sps:$4 sm:$0xff]   ;;  %v2978_v1 = vld [vmem:[#allocation9 + $0xc] ss:$16 sps:$4 sm:$0xff]  }
 0x579   :  { %1391 = vmatprep.subr.bf16.mxu1 %v2599_v5  ;;  %1432 = vmatprep.subr.bf16.mxu0 %v2601_v6 }
 0x57a   :  { %1421 = vmatprep.mubr.bf16.mxu1 %v3154_v22  ;;  %1462 = vmatprep.mubr.bf16.mxu0 %v3154_v22 }
 0x57c   :  { %1392 = vmatpush1.bf16.msra.mxu1 %v2609_v12  ;;  %1433 = vmatpush1.bf16.msra.mxu0 %v2611_v13  ;;  %v3161_v12 = vld [vmem:[#allocation23_spill] sm:$0xff] }
 0x57d   :  { %1393 = vmatprep.subr.bf16.mxu1 %v2615_v16  ;;  %1434 = vmatprep.subr.bf16.mxu0 %v2617_v17  ;;  %v3162_v16 = vld [vmem:[#allocation24_spill] sm:$0xff] }
 0x580   :  { %1394 = vmatpush1.bf16.msra.mxu1 %v2624_v23  ;;  %1435 = vmatpush1.bf16.msra.mxu0 %v2626_v24 }
 0x581   :  { %1395 = vmatprep.subr.bf16.mxu1 %v2631_v28  ;;  %1436 = vmatprep.subr.bf16.mxu0 %v2633_v29  ;;  %v3163_v28 = vld [vmem:[#allocation25_spill] sm:$0xff] }
 0x584   :  { %1396 = vmatpush1.bf16.msra.mxu1 %v2641_v35  ;;  %1437 = vmatpush1.bf16.msra.mxu0 %v2643_v36  ;;  %v3164_v35 = vld [vmem:[#allocation26_spill] sm:$0xff] }
 0x585   :  { %1397 = vmatprep.subr.bf16.mxu1 %v2647_v39  ;;  %1438 = vmatprep.subr.bf16.mxu0 %v2649_v40 }
 0x588   :  { %1398 = vmatpush1.bf16.msra.mxu1 %v2656_v50  ;;  %1439 = vmatpush1.bf16.msra.mxu0 %v2658_v51 }
 0x589   :  { %1399 = vmatprep.subr.bf16.mxu1 %v2663_v55  ;;  %1440 = vmatprep.subr.bf16.mxu0 %v2665_v56 }
 0x58c   :  { %1400 = vmatpush1.bf16.msra.mxu1 %v2673_v62  ;;  %1441 = vmatpush1.bf16.msra.mxu0 %v2675_v63 }
 0x58d   :  { %1401 = vmatprep.subr.bf16.mxu1 %v2679_v46  ;;  %1442 = vmatprep.subr.bf16.mxu0 %v2681_v4 }
 0x590   :  { %1402 = vmatpush1.bf16.msra.mxu1 %v2687_v9  ;;  %1443 = vmatpush1.bf16.msra.mxu0 %v2689_v10 }
 0x591   :  { %1403 = vmatprep.subr.bf16.mxu1 %v2693_v14  ;;  %1444 = vmatprep.subr.bf16.mxu0 %v2695_v15 }
 0x594   :  { %1404 = vmatpush1.bf16.msra.mxu1 %v2701_v18  ;;  %1445 = vmatpush1.bf16.msra.mxu0 %v2703_v19 }
 0x595   :  { %1505 = vmatprep.subr.bf16.mxu1 %v2975_v0  ;;  %1546 = vmatprep.subr.bf16.mxu0 %v2978_v1 }
 0x64a   :  { %v1307_v5 = vpop.f32.mrb[32].mxu1  ;;  %v1348_v6 = vpop.f32.mrb[48].mxu0 }
 0x64b   :  { %v1355_v13 = vadd.f32 %v1307_v5, %v3161_v12  ;;  %v1357_v17 = vadd.f32 %v1348_v6, %v3162_v16  ;;  %v1309_v23 = vpop.f32.mrb[33].mxu1  ;;  %v1350_v24 = vpop.f32.mrb[49].mxu0  ;;  %v3039_v5 = vld [vmem:[#allocation9 + $0x80] ss:$16 sps:$4 sm:$0xff]   ;;  %v3042_v6 = vld [vmem:[#allocation9 + $0x88] ss:$16 sps:$4 sm:$0xff]  }
 0x64c   :  { %v1356_v29 = vadd.f32 %v1309_v23, %v3163_v28  ;;  %v1358_v36 = vadd.f32 %v1350_v24, %v3164_v35  ;;  %v1311_v39 = vpop.f32.mrb[34].mxu1  ;;  %v1352_v40 = vpop.f32.mrb[50].mxu0  ;;  %v3045_v12 = vld [vmem:[#allocation9 + $0xa4] ss:$16 sps:$4 sm:$0xff]   ;;  %v3167_v23 = vld [vmem:[#allocation29_spill] sm:$0xff] }
 0x64d   :  { %v1922_v50 = vmul.f32 -1.442695, %v1355_v13  ;;  %v1312_v51 = vpop.f32.mrb[35].mxu1  ;;  %v1353_v55 = vpop.f32.mrb[51].mxu0  ;;  %v3048_v13 = vld [vmem:[#allocation9 + $0xac] ss:$16 sps:$4 sm:$0xff]  }
 0x64e   :  { %v1923_v56 = vmul.f32 -1.442695, %v1356_v29  ;;  %v1924_v59 = vmul.f32 -1.442695, %v1358_v36  ;;  %v3166_v16 = vld [vmem:[#allocation28_spill] sm:$0xff]  ;;  %v3168_v24 = vld [vmem:[#allocation30_spill] sm:$0xff] }
 0x64f   :  { %2199 = vpow2.f32 %v1922_v50 }
 0x650   :  { %2201 = vpow2.f32 %v1923_v56 }
 0x651   :  { %2203 = vpow2.f32 %v1924_v59 }
 0x652   :  { %2205 = vtanh.f32 %v1357_v17 }
 0x659   :  { %v2200_v48 = vpop.eup %2199 }
 0x65a   :  { %v2202_v31 = vpop.eup %2201  ;;  %v1362_v32 = vadd.f32 1.0, %v2200_v48 }
 0x65b   :  { %v1368_v33 = vadd.f32 1.0, %v2202_v31  ;;  %v2204_v34 = vpop.eup %2203 }
 0x65c   :  { %2207 = vrcp.f32 %v1362_v32  ;;  %v2206_v37 = vpop.eup %2205  ;;  %v1375_v11 = vadd.f32 1.0, %v2204_v34 }
 0x65d   :  { %2209 = vrcp.f32 %v1368_v33 }
 0x65e   :  { %2211 = vrcp.f32 %v1375_v11  ;;  %v2287_v11 = vld [vmem:[#allocation9 + $0xc4] ss:$16 sps:$4 sm:$0xff]  }
 0x666   :  { %v2208_v38 = vpop.eup %2207 }
 0x667   :  { %v2210_v41 = vpop.eup %2209  ;;  %v1379_v42 = vmul.f32 %v2208_v38, %v2206_v37 }
 0x668   :  { %v1378_v49 = vmul.f32 %v2210_v41, %v2940_v20  ;;  %v2212_v57 = vpop.eup %2211  ;;  %v3024_v20 = vld [vmem:[#allocation9 + $0x6c] ss:$16 sps:$4 sm:$0xff]  }
 0x66a   :  { %v2986_v52 = vadd.f32 %v1379_v42, %v1378_v49  ;;  %v2286_v42 = vld [vmem:[#allocation9 + $0xa8] ss:$16 sps:$4 sm:$0xff]   ;;  %v2288_v49 = vld [vmem:[#allocation9 + $0xcc] ss:$16 sps:$4 sm:$0xff]  }
 0x66c   :  { %2213 = vtanh.f32 %v2986_v52 }
 0x676   :  { %v2214_v8 = vpop.eup %2213 }
 0x677   :  { %v1382_v43 = vmul.f32 %v2214_v8, %v2212_v57  ;;  %v2290_v57 = vld [vmem:[#allocation9 + $0xc8] ss:$16 sps:$4 sm:$0xff]   ;;  %v2291_v8 = vld [vmem:[#allocation9 + $0xe4] ss:$16 sps:$4 sm:$0xff]  }
 0x679   :  { %v1388_v44 = vpack.c.bf16 %v1382_v43, %v1382_v43  ;;  %v2292_v43 = vld [vmem:[#allocation9 + $0xec] ss:$16 sps:$4 sm:$0xff]  }
 0x67b   :  { %1422 = vmatmul.mubr.bf16.vlgmr.msra.gmra.mrb[36].mxu1 %v1388_v44  ;;  %1463 = vmatmul.mubr.bf16.vlgmr.msra.gmra.mrb[52].mxu0 %v1388_v44  ;;  %v2293_v44 = vld [vmem:[#allocation9 + $0xe0] ss:$16 sps:$4 sm:$0xff]  }
 0x67c   :  { %1506 = vmatpush1.bf16.msra.mxu1 %v2989_v61  ;;  %1547 = vmatpush1.bf16.msra.mxu0 %v2992_v2 }
 0x67d   :  { %1507 = vmatprep.subr.bf16.mxu1 %v2995_v58  ;;  %1548 = vmatprep.subr.bf16.mxu0 %v2998_v25 }
 0x67e   :  { %1537 = vmatprep.mubr.bf16.mxu1 %v3154_v22  ;;  %1578 = vmatprep.mubr.bf16.mxu0 %v3154_v22 }
 0x680   :  { %1508 = vmatpush1.bf16.msra.mxu1 %v3003_v30  ;;  %1549 = vmatpush1.bf16.msra.mxu0 %v3006_v7 }
 0x681   :  { %1509 = vmatprep.subr.bf16.mxu1 %v3009_v60  ;;  %1550 = vmatprep.subr.bf16.mxu0 %v3012_v27 }
 0x684   :  { %1510 = vmatpush1.bf16.msra.mxu1 %v3015_v53  ;;  %1551 = vmatpush1.bf16.msra.mxu0 %v3018_v3 }
 0x685   :  { %1511 = vmatprep.subr.bf16.mxu1 %v3021_v54  ;;  %1552 = vmatprep.subr.bf16.mxu0 %v3024_v20 }
 0x688   :  { %1512 = vmatpush1.bf16.msra.mxu1 %v3027_v45  ;;  %1553 = vmatpush1.bf16.msra.mxu0 %v3030_v21 }
 0x689   :  { %1513 = vmatprep.subr.bf16.mxu1 %v3033_v26  ;;  %1554 = vmatprep.subr.bf16.mxu0 %v3036_v47 }
 0x68c   :  { %1514 = vmatpush1.bf16.msra.mxu1 %v3039_v5  ;;  %1555 = vmatpush1.bf16.msra.mxu0 %v3042_v6 }
 0x68d   :  { %1515 = vmatprep.subr.bf16.mxu1 %v3045_v12  ;;  %1556 = vmatprep.subr.bf16.mxu0 %v3048_v13 }
 0x690   :  { %1516 = vmatpush1.bf16.msra.mxu1 %v2673_v62  ;;  %1557 = vmatpush1.bf16.msra.mxu0 %v2675_v63 }
 0x691   :  { %1517 = vmatprep.subr.bf16.mxu1 %v2679_v46  ;;  %1558 = vmatprep.subr.bf16.mxu0 %v2681_v4  ;;  %v3165_v46 = vld [vmem:[#allocation27_spill] sm:$0xff] }
 0x694   :  { %1518 = vmatpush1.bf16.msra.mxu1 %v2687_v9  ;;  %1559 = vmatpush1.bf16.msra.mxu0 %v2689_v10 }
 0x695   :  { %1519 = vmatprep.subr.bf16.mxu1 %v2693_v14  ;;  %1560 = vmatprep.subr.bf16.mxu0 %v2695_v15 }
 0x698   :  { %1520 = vmatpush1.bf16.msra.mxu1 %v2701_v18  ;;  %1561 = vmatpush1.bf16.msra.mxu0 %v2703_v19 }
 0x699   :  { %1621 = vmatprep.subr.bf16.mxu1 %v2975_v0  ;;  %1662 = vmatprep.subr.bf16.mxu0 %v2978_v1 }
 0x74e   :  { %v1423_v62 = vpop.f32.mrb[36].mxu1  ;;  %v1464_v63 = vpop.f32.mrb[52].mxu0 }
 0x74f   :  { %v1471_v4 = vadd.f32 %v1423_v62, %v3165_v46  ;;  %v1473_v9 = vadd.f32 %v1464_v63, %v3166_v16  ;;  %v1425_v17 = vpop.f32.mrb[37].mxu1  ;;  %v1466_v10 = vpop.f32.mrb[53].mxu0 }
 0x750   :  { %v1472_v14 = vadd.f32 %v1425_v17, %v3167_v23  ;;  %v1474_v15 = vadd.f32 %v1466_v10, %v3168_v24  ;;  %v1427_v28 = vpop.f32.mrb[38].mxu1  ;;  %v1468_v18 = vpop.f32.mrb[54].mxu0 }
 0x751   :  { %v1925_v29 = vmul.f32 -1.442695, %v1471_v4  ;;  %v1428_v19 = vpop.f32.mrb[39].mxu1  ;;  %v1469_v35 = vpop.f32.mrb[55].mxu0 }
 0x752   :  { %v1926_v0 = vmul.f32 -1.442695, %v1472_v14  ;;  %v1927_v1 = vmul.f32 -1.442695, %v1474_v15  ;;  %v1731_v35 = vld [vmem:[#allocation11] sm:$0xff] }
 0x753   :  { %2215 = vpow2.f32 %v1925_v29 }
 0x754   :  { %2217 = vpow2.f32 %v1926_v0  ;;  %v1732_v0 = vld [vmem:[#allocation11 + $0x8] sm:$0xff] }
 0x755   :  { %2219 = vpow2.f32 %v1927_v1  ;;  %v2021_v1 = vpack.c.bf16 %v1732_v0, %v1731_v35 }
 0x756   :  { %2221 = vtanh.f32 %v1473_v9 }
 0x75d   :  { %v2216_v36 = vpop.eup %2215 }
 0x75e   :  { %v2218_v39 = vpop.eup %2217  ;;  %v1478_v40 = vadd.f32 1.0, %v2216_v36  ;;  %v2447_v36 = vmov 0.0|0.0  }
 0x75f   :  { %v1484_v50 = vadd.f32 1.0, %v2218_v39  ;;  %v2220_v51 = vpop.eup %2219  ;;  %v1733_v39 = vld [vmem:[#allocation11 + $0x10] sm:$0xff] }
 0x760   :  { %2223 = vrcp.f32 %v1478_v40  ;;  %v2222_v55 = vpop.eup %2221  ;;  %v1491_v31 = vadd.f32 1.0, %v2220_v51  ;;  %v1734_v40 = vld [vmem:[#allocation11 + $0x18] sm:$0xff]  ;;  %v1735_v51 = vld [vmem:[#allocation11 + $0x20] sm:$0xff] }
 0x761   :  { %2225 = vrcp.f32 %v1484_v50  ;;  %v2024_v50 = vpack.c.bf16 %v1734_v40, %v1733_v39 }
 0x762   :  { %2227 = vrcp.f32 %v1491_v31 }
 0x76a   :  { %v2224_v56 = vpop.eup %2223 }
 0x76b   :  { %v2226_v59 = vpop.eup %2225  ;;  %v1495_v48 = vmul.f32 %v2224_v56, %v2222_v55  ;;  %v1736_v55 = vld [vmem:[#allocation11 + $0x28] sm:$0xff] }
 0x76c   :  { %v1494_v32 = vmul.f32 %v2226_v59, %v2986_v52  ;;  %v2228_v34 = vpop.eup %2227  ;;  %v2289_v52 = vld [vmem:[#allocation9 + $0xc0] ss:$16 sps:$4 sm:$0xff]   ;;  %v2027_v56 = vpack.c.bf16 %v1736_v55, %v1735_v51 }
 0x76d   :  { %v1737_v59 = vld [vmem:[#allocation11 + $0x30] sm:$0xff] }
 0x76e   :  { %v3068_v33 = vadd.f32 %v1495_v48, %v1494_v32  ;;  %v1738_v48 = vld [vmem:[#allocation11 + $0x38] sm:$0xff]  ;;  %v1739_v32 = vld [vmem:[#allocation11 + $0x40] sm:$0xff] }
 0x76f   :  { %v2030_v31 = vpack.c.bf16 %v1738_v48, %v1737_v59 }
 0x770   :  { %2229 = vtanh.f32 %v3068_v33 }
 0x77a   :  { %v2230_v37 = vpop.eup %2229 }
 0x77b   :  { %v1498_v38 = vmul.f32 %v2230_v37, %v2228_v34  ;;  %v1741_v37 = vld [vmem:[#allocation11 + $0x50] sm:$0xff] }
 0x77d   :  { %v1504_v41 = vpack.c.bf16 %v1498_v38, %v1498_v38  ;;  %v1742_v38 = vld [vmem:[#allocation11 + $0x58] sm:$0xff] }
 0x77f   :  { %1538 = vmatmul.mubr.bf16.vlgmr.msra.gmra.mrb[40].mxu1 %v1504_v41  ;;  %1579 = vmatmul.mubr.bf16.vlgmr.msra.gmra.mrb[56].mxu0 %v1504_v41  ;;  %v1743_v41 = vld [vmem:[#allocation11 + $0x60] sm:$0xff] }
 0x780   :  { %1622 = vmatpush1.bf16.msra.mxu1 %v2989_v61  ;;  %1663 = vmatpush1.bf16.msra.mxu0 %v2992_v2  ;;  %v2294_v61 = vld [vmem:[#allocation9 + $0xe8] ss:$16 sps:$4 sm:$0xff]  }
 0x781   :  { %1623 = vmatprep.subr.bf16.mxu1 %v2995_v58  ;;  %1664 = vmatprep.subr.bf16.mxu0 %v2998_v25  ;;  %v3169_v25 = vld [vmem:[#allocation31_spill] sm:$0xff] }
 0x782   :  { %1653 = vmatprep.mubr.bf16.mxu1 %v3154_v22  ;;  %1694 = vmatprep.mubr.bf16.mxu0 %v3154_v22  ;;  %v2285_v22 = vld [vmem:[#allocation9 + $0xa0] ss:$16 sps:$4 sm:$0xff]  }
 0x784   :  { %1624 = vmatpush1.bf16.msra.mxu1 %v3003_v30  ;;  %1665 = vmatpush1.bf16.msra.mxu0 %v3006_v7  ;;  %v3170_v7 = vld [vmem:[#allocation32_spill] sm:$0xff] }
 0x785   :  { %1625 = vmatprep.subr.bf16.mxu1 %v3009_v60  ;;  %1666 = vmatprep.subr.bf16.mxu0 %v3012_v27 }
 0x788   :  { %1626 = vmatpush1.bf16.msra.mxu1 %v3015_v53  ;;  %1667 = vmatpush1.bf16.msra.mxu0 %v3018_v3  ;;  %v3171_v3 = vld [vmem:[#allocation33_spill] sm:$0xff] }
 0x789   :  { %1627 = vmatprep.subr.bf16.mxu1 %v3021_v54  ;;  %1668 = vmatprep.subr.bf16.mxu0 %v3024_v20  ;;  %v3172_v20 = vld [vmem:[#allocation34_spill] sm:$0xff] }
 0x78c   :  { %1628 = vmatpush1.bf16.msra.mxu1 %v3027_v45  ;;  %1669 = vmatpush1.bf16.msra.mxu0 %v3030_v21 }
 0x78d   :  { %1629 = vmatprep.subr.bf16.mxu1 %v3033_v26  ;;  %1670 = vmatprep.subr.bf16.mxu0 %v3036_v47 }
 0x790   :  { %1630 = vmatpush1.bf16.msra.mxu1 %v3039_v5  ;;  %1671 = vmatpush1.bf16.msra.mxu0 %v3042_v6 }
 0x791   :  { %1631 = vmatprep.subr.bf16.mxu1 %v3045_v12  ;;  %1672 = vmatprep.subr.bf16.mxu0 %v3048_v13 }
 0x794   :  { %1632 = vmatpush1.bf16.msra.mxu1 %v2285_v22  ;;  %1673 = vmatpush1.bf16.msra.mxu0 %v2286_v42  ;;  %v2036_v22 = vpack.c.bf16 %v1742_v38, %v1741_v37  ;;  %v1744_v42 = vld [vmem:[#allocation11 + $0x68] sm:$0xff] }
 0x795   :  { %1633 = vmatprep.subr.bf16.mxu1 %v2287_v11  ;;  %1674 = vmatprep.subr.bf16.mxu0 %v2288_v49  ;;  %v2449_v11 = vmov 0.0   ;;  %v2039_v49 = vpack.c.bf16 %v1744_v42, %v1743_v41 }
 0x798   :  { %1634 = vmatpush1.bf16.msra.mxu1 %v2289_v52  ;;  %1675 = vmatpush1.bf16.msra.mxu0 %v2290_v57  ;;  %v1745_v52 = vld [vmem:[#allocation11 + $0x70] sm:$0xff]  ;;  %v1746_v57 = vld [vmem:[#allocation11 + $0x78] sm:$0xff] }
 0x799   :  { %1635 = vmatprep.subr.bf16.mxu1 %v2291_v8  ;;  %1676 = vmatprep.subr.bf16.mxu0 %v2292_v43  ;;  %v2042_v8 = vpack.c.bf16 %v1746_v57, %v1745_v52 }
 0x79c   :  { %1636 = vmatpush1.bf16.msra.mxu1 %v2293_v44  ;;  %1677 = vmatpush1.bf16.msra.mxu0 %v2294_v61  ;;  %v3173_v61 = vld [vmem:[#allocation35_spill] sm:$0xff] }
 0x79d   :  { %2020 = vmatprep.subr.bf16.mxu1 %v2447_v36 }
 0x852   :  { %v1539_v2 = vpop.f32.mrb[40].mxu1  ;;  %v1580_v58 = vpop.f32.mrb[56].mxu0 }
 0x853   :  { %v1587_v30 = vadd.f32 %v1539_v2, %v3169_v25  ;;  %v1589_v60 = vadd.f32 %v1580_v58, %v3170_v7  ;;  %v1541_v27 = vpop.f32.mrb[41].mxu1  ;;  %v1582_v53 = vpop.f32.mrb[57].mxu0  ;;  %v3174_v58 = vld [vmem:[#allocation36_spill] sm:$0xff] }
 0x854   :  { %v1588_v54 = vadd.f32 %v1541_v27, %v3171_v3  ;;  %v1590_v45 = vadd.f32 %v1582_v53, %v3172_v20  ;;  %v1543_v21 = vpop.f32.mrb[42].mxu1  ;;  %v1584_v26 = vpop.f32.mrb[58].mxu0  ;;  %v3176_v53 = vld [vmem:[#allocation38_spill] sm:$0xff] }
 0x855   :  { %v1928_v47 = vmul.f32 -1.442695, %v1587_v30  ;;  %v1544_v5 = vpop.f32.mrb[43].mxu1  ;;  %v1585_v6 = vpop.f32.mrb[59].mxu0 }
 0x856   :  { %v1929_v12 = vmul.f32 -1.442695, %v1588_v54  ;;  %v1930_v13 = vmul.f32 -1.442695, %v1590_v45 }
 0x857   :  { %2231 = vpow2.f32 %v1928_v47 }
 0x858   :  { %2233 = vpow2.f32 %v1929_v12 }
 0x859   :  { %2235 = vpow2.f32 %v1930_v13 }
 0x85a   :  { %2237 = vtanh.f32 %v1589_v60  ;;  %v3175_v60 = vld [vmem:[#allocation37_spill] sm:$0xff] }
 0x861   :  { %v2232_v62 = vpop.eup %2231 }
 0x862   :  { %v2234_v63 = vpop.eup %2233  ;;  %v1594_v46 = vadd.f32 1.0, %v2232_v62 }
 0x863   :  { %v1600_v4 = vadd.f32 1.0, %v2234_v63  ;;  %v2236_v16 = vpop.eup %2235 }
 0x864   :  { %2239 = vrcp.f32 %v1594_v46  ;;  %v2238_v9 = vpop.eup %2237  ;;  %v1607_v14 = vadd.f32 1.0, %v2236_v16 }
 0x865   :  { %2241 = vrcp.f32 %v1600_v4 }
 0x866   :  { %2243 = vrcp.f32 %v1607_v14 }
 0x86e   :  { %v2240_v17 = vpop.eup %2239 }
 0x86f   :  { %v2242_v10 = vpop.eup %2241  ;;  %v1611_v23 = vmul.f32 %v2240_v17, %v2238_v9 }
 0x870   :  { %v1610_v24 = vmul.f32 %v2242_v10, %v3068_v33  ;;  %v2244_v28 = vpop.eup %2243  ;;  %v1740_v33 = vld [vmem:[#allocation11 + $0x48] sm:$0xff] }
 0x871   :  { %v2033_v34 = vpack.c.bf16 %v1740_v33, %v1739_v32 }
 0x872   :  { %v3098_v15 = vadd.f32 %v1611_v23, %v1610_v24 }
 0x874   :  { %2245 = vtanh.f32 %v3098_v15 }
 0x87e   :  { %v2246_v18 = vpop.eup %2245 }
 0x87f   :  { %v1614_v29 = vmul.f32 %v2246_v18, %v2244_v28  ;;  %v1934_v18 = vld [vmem:[%s3128_s7] ss:$0 sm:$0xff] }
 0x881   :  { %v1620_v19 = vpack.c.bf16 %v1614_v29, %v1614_v29 }
 0x883   :  { %1654 = vmatmul.mubr.bf16.vlgmr.msra.gmra.mrb[44].mxu1 %v1620_v19  ;;  %1695 = vmatmul.mubr.bf16.vlgmr.msra.gmra.mrb[60].mxu0 %v1620_v19 }
 0x884   :  { %2022 = vmatpush3.bf16.msra.mxu1 %v2021_v1  ;;  %2017 = vmatprep.mubr.msk.f32.mxu1 %vm2448_vm2, %v2449_v11 }
 0x885   :  { %2023 = vmatprep.subr.bf16.mxu1 %v2447_v36 }
 0x888   :  { %2025 = vmatpush3.bf16.msra.mxu1 %v2024_v50 }
 0x889   :  { %2026 = vmatprep.subr.bf16.mxu1 %v2447_v36 }
 0x88c   :  { %2028 = vmatpush3.bf16.msra.mxu1 %v2027_v56 }
 0x88d   :  { %2029 = vmatprep.subr.bf16.mxu1 %v2447_v36 }
 0x890   :  { %2031 = vmatpush3.bf16.msra.mxu1 %v2030_v31 }
 0x891   :  { %2032 = vmatprep.subr.bf16.mxu1 %v2447_v36 }
 0x894   :  { %2034 = vmatpush3.bf16.msra.mxu1 %v2033_v34 }
 0x895   :  { %2035 = vmatprep.subr.bf16.mxu1 %v2447_v36 }
 0x898   :  { %2037 = vmatpush3.bf16.msra.mxu1 %v2036_v22 }
 0x899   :  { %2038 = vmatprep.subr.bf16.mxu1 %v2447_v36 }
 0x89c   :  { %2040 = vmatpush3.bf16.msra.mxu1 %v2039_v49 }
 0x89d   :  { %2041 = vmatprep.subr.bf16.mxu1 %v2447_v36 }
 0x8a0   :  { %2043 = vmatpush3.bf16.msra.mxu1 %v2042_v8 }
 0x956   :  { %v1655_v43 = vpop.f32.mrb[44].mxu1  ;;  %v1696_v44 = vpop.f32.mrb[60].mxu0 }
 0x957   :  { %v1703_v2 = vadd.f32 %v1655_v43, %v3173_v61  ;;  %v1705_v25 = vadd.f32 %v1696_v44, %v3174_v58  ;;  %v1657_v30 = vpop.f32.mrb[45].mxu1  ;;  %v1698_v7 = vpop.f32.mrb[61].mxu0 }
 0x958   :  { %v1704_v27 = vadd.f32 %v1657_v30, %v3175_v60  ;;  %v1706_v3 = vadd.f32 %v1698_v7, %v3176_v53  ;;  %v1659_v54 = vpop.f32.mrb[46].mxu1  ;;  %v1700_v20 = vpop.f32.mrb[62].mxu0 }
 0x959   :  { %v1931_v45 = vmul.f32 -1.442695, %v1703_v2  ;;  %v1660_v21 = vpop.f32.mrb[47].mxu1  ;;  %v1701_v26 = vpop.f32.mrb[63].mxu0 }
 0x95a   :  { %v1932_v47 = vmul.f32 -1.442695, %v1704_v27  ;;  %v1933_v5 = vmul.f32 -1.442695, %v1706_v3 }
 0x95b   :  { %2247 = vpow2.f32 %v1931_v45 }
 0x95c   :  { %2249 = vpow2.f32 %v1932_v47 }
 0x95d   :  { %2251 = vpow2.f32 %v1933_v5 }
 0x95e   :  { %2253 = vtanh.f32 %v1705_v25 }
 0x965   :  { %v2248_v6 = vpop.eup %2247 }
 0x966   :  { %v2250_v12 = vpop.eup %2249  ;;  %v1710_v13 = vadd.f32 1.0, %v2248_v6 }
 0x967   :  { %v1716_v62 = vadd.f32 1.0, %v2250_v12  ;;  %v2252_v63 = vpop.eup %2251 }
 0x968   :  { %2255 = vrcp.f32 %v1710_v13  ;;  %v2254_v46 = vpop.eup %2253  ;;  %v1723_v17 = vadd.f32 1.0, %v2252_v63 }
 0x969   :  { %2257 = vrcp.f32 %v1716_v62 }
 0x96a   :  { %2259 = vrcp.f32 %v1723_v17 }
 0x972   :  { %v2256_v4 = vpop.eup %2255 }
 0x973   :  { %v2258_v16 = vpop.eup %2257  ;;  %v1727_v9 = vmul.f32 %v2256_v4, %v2254_v46 }
 0x974   :  { %v1726_v10 = vmul.f32 %v2258_v16, %v3098_v15  ;;  %v2260_v14 = vpop.eup %2259 }
 0x976   :  { %v1728_v23 = vadd.f32 %v1727_v9, %v1726_v10 }
 0x978   :  { %2261 = vtanh.f32 %v1728_v23 }
 0x982   :  { %v2262_v24 = vpop.eup %2261 }
 0x983   :  { %v1730_v28 = vmul.f32 %v2262_v24, %v2260_v14 }
 0x985   :  { %2018 = vmatmul.mubr.f32.vlgmr.msra.gmra.mrb[48].mxu1 %v1730_v28 }
 0xa58   :  { %v1820_v29 = vpop.f32.mrb[48].mxu1 }
 0xa59   :  { %v1821_v19 = vadd.f32 %v1934_v18, %v1820_v29  ;;  %v2019_v35 = vpop.f32.mrb[49].mxu1 }
 0xa5b   :  { %1824 = vst [vmem:[#allocation12] sm:$0xff] %v1821_v19 }
 0xa5c   :  { %2416 = shalt.err (!%p2413_p2)
}
 0xa5d   :  { %s2417_s1 = scalar_lea.hbm %s3129_s8, 128 }
 0xa5e   :  { %p2418_p3 = scmp.ne.s32.totalorder %s3129_s8, %s2417_s1  ;;  %p2421_p4 = scmp.lt.u32.totalorder %s2417_s1, %s3129_s8 }
 0xa60   :  { %p2423_p5 = pnand %p2421_p4, %p2418_p3 }
 0xa62   :  { %2426 = shalt.err (!%p2423_p5)
}
 0xa63   :  { %1834 = dma.vmem_to_hbm [thread:$0]  %s1832_s26, 128, %s3129_s8, [#allocation5]  }
 0xa64   :  { %2433 = dma.done.wait [#allocation5], 128  }
 0xa65   :  { %2434 = vsyncadd [#allocation5], 4294967168 }
 0xa66   :  { %1838 = vsyncpa [#allocation4], 1 }
 0xa67   :  { %1839 = vsyncpa [#allocation7], 1 }
 0xa68   :  { %1840 = vsyncpa [#allocation10], 1 }
 0xa69   :  { %1841 = vsyncpa [#allocation5], 1 }

</bundles_post_ra>
